<compile_context>
chip_gen: v7x
topology: tpu7x:2x2x1
jax: 0.10.0
libtpu: 0.0.40
codegen_flags: <defaults>
</compile_context>

<pallas_src>
import functools

import jax
import jax.numpy as jnp
from jax.experimental import pallas as pl
from jax.experimental.pallas import tpu as pltpu

IN_FEATURES = 784
BOTTLENECK = 794          # PyTorch hidden size
HIDDEN_PAD = 896          # 7 * 128, lane-aligned padded hidden size
NUM_CLASSES = 10
CLASSES_PAD = 128         # lane-dense padded output width
NEG_SLOPE = 0.2

DEFAULT_TM = 2048         # batch tile cap (v5e/v6e/v7x safe at 48 MiB VMEM limit)


def _round_up(n, m):
    return ((n + m - 1) // m) * m


def _choose_tm(batch, tm_cap=DEFAULT_TM):
    """Batch tile: multiple of 16 (bf16 sublane packing), no jnp.pad of the input.
    For batch > 256 we force >= 2 tiles so v7x megacore can split the grid."""
    if batch <= 256:
        return _round_up(batch, 16)                 # single small (possibly ragged) tile
    n_tiles = max(2, -(-batch // tm_cap))           # ceil-div, at least 2 tiles
    return _round_up(-(-batch // n_tiles), 16)


def mlp_kernel(x_ref, w1_ref, b1_ref, w2_ref, b2_ref, o_ref):
    # In-kernel f32 -> bf16 cast: VPU work, hidden under the MXU-bound fc1 matmul.
    x = x_ref[...].astype(jnp.bfloat16)

    # fc1 (bf16 MXU matmul, f32 accumulate) + bias + LeakyReLU(0.2) in f32.
    h = jnp.dot(x, w1_ref[...], preferred_element_type=jnp.float32)       # (TM, 896) f32
    h = h + b1_ref[...]                                                    # broadcast (1, 896)
    h = jnp.maximum(h, NEG_SLOPE * h)                                      # LeakyReLU, 2 VPU ops

    # fc2 (f32, tiny) + bias; padded classes carry a -1e30 bias -> softmax ~ 0.
    logits = jnp.dot(h, w2_ref[...], preferred_element_type=jnp.float32)   # (TM, 128)
    logits = logits + b2_ref[...]                                          # broadcast (1, 128)

    # Numerically-stable softmax over dim=1 with an EXACT divide so every row
    # sums to 1 to f32 precision.
    m = jnp.max(logits, axis=1, keepdims=True)
    e = jnp.exp(logits - m)
    denom = jnp.sum(e, axis=1, keepdims=True)
    o_ref[...] = (e / denom).astype(o_ref.dtype)


@functools.partial(jax.jit, static_argnames=("tm",))
def net_forward(x, w1, b1, w2, b2, *, tm=DEFAULT_TM):
    """x: (B, 784) f32; w1: (784, 896) bf16; b1: (1, 896) f32;
    w2: (896, 128) f32; b2: (1, 128) f32. Returns (B, 10) f32 softmax probs."""
    B = x.shape[0]
    TM = _choose_tm(B, tm)
    grid = (pl.cdiv(B, TM),)

    cost = pl.CostEstimate(
        flops=2 * B * (IN_FEATURES * HIDDEN_PAD + HIDDEN_PAD * CLASSES_PAD),
        transcendentals=B * CLASSES_PAD,
        bytes_accessed=(x.size * x.dtype.itemsize
                        + B * CLASSES_PAD * 4
                        + w1.size * w1.dtype.itemsize
                        + b1.size * b1.dtype.itemsize
                        + w2.size * w2.dtype.itemsize
                        + b2.size * b2.dtype.itemsize),
    )

    out = pl.pallas_call(
        mlp_kernel,
        out_shape=jax.ShapeDtypeStruct((B, CLASSES_PAD), jnp.float32),
        grid=grid,
        in_specs=[
            pl.BlockSpec((TM, IN_FEATURES), lambda i: (i, 0)),           # x: streamed per tile
            pl.BlockSpec((IN_FEATURES, HIDDEN_PAD), lambda i: (0, 0)),   # w1: resident
            pl.BlockSpec((1, HIDDEN_PAD), lambda i: (0, 0)),             # b1: resident
            pl.BlockSpec((HIDDEN_PAD, CLASSES_PAD), lambda i: (0, 0)),   # w2: resident
            pl.BlockSpec((1, CLASSES_PAD), lambda i: (0, 0)),            # b2: resident
        ],
        out_specs=pl.BlockSpec((TM, CLASSES_PAD), lambda i: (i, 0)),     # lane-dense output
        compiler_params=pltpu.CompilerParams(
            dimension_semantics=("parallel",),       # megacore batch sharding on v7x
            vmem_limit_bytes=48 * 1024 * 1024,       # ~25 MiB footprint at TM=2048 + headroom
        ),
        cost_estimate=cost,
    )(x, w1, b1, w2, b2)

    return out[:, :NUM_CLASSES]


def init_params(key):
    """PyTorch nn.Linear-style init (U(-1/sqrt(fan_in), +)), f32, unpadded,
    stored as (in, out) so the kernel computes x @ W (== PyTorch x @ W_pt.T)."""
    k1, k2, k3, k4 = jax.random.split(key, 4)
    bound1 = 1.0 / jnp.sqrt(IN_FEATURES)
    bound2 = 1.0 / jnp.sqrt(BOTTLENECK)
    w1 = jax.random.uniform(k1, (IN_FEATURES, BOTTLENECK), jnp.float32, -bound1, bound1)
    b1 = jax.random.uniform(k2, (1, BOTTLENECK), jnp.float32, -bound1, bound1)
    w2 = jax.random.uniform(k3, (BOTTLENECK, NUM_CLASSES), jnp.float32, -bound2, bound2)
    b2 = jax.random.uniform(k4, (1, NUM_CLASSES), jnp.float32, -bound2, bound2)
    return w1, b1, w2, b2


def pad_and_cast_params(w1, b1, w2, b2):
    """Zero-pad hidden 794->896 (bit-identical forward) and pad classes 10->128
    with -1e30 biases (padded classes softmax to 0); cast W1 to bf16 for the MXU."""
    w1p = jnp.zeros((IN_FEATURES, HIDDEN_PAD), jnp.float32).at[:, :BOTTLENECK].set(w1)
    b1p = jnp.zeros((1, HIDDEN_PAD), jnp.float32).at[:, :BOTTLENECK].set(b1)
    w2p = jnp.zeros((HIDDEN_PAD, CLASSES_PAD), jnp.float32).at[:BOTTLENECK, :NUM_CLASSES].set(w2)
    b2p = jnp.full((1, CLASSES_PAD), -1e30, jnp.float32).at[:, :NUM_CLASSES].set(b2)
    return w1p.astype(jnp.bfloat16), b1p, w2p, b2p


if __name__ == "__main__":
    key = jax.random.PRNGKey(0)
    k_x, k_p = jax.random.split(key)

    B = 8
    x = jax.random.uniform(k_x, (B, IN_FEATURES), jnp.float32)  # MNIST-like pixels in [0,1)
    w1, b1, w2, b2 = init_params(k_p)
    w1p, b1p, w2p, b2p = pad_and_cast_params(w1, b1, w2, b2)

    out = net_forward(x, w1p, b1p, w2p, b2p)
    out = jax.block_until_ready(out)

    # Pure-JAX reference at matching precision (bf16-quantized x / W1, f32 math).
    xq = x.astype(jnp.bfloat16).astype(jnp.float32)
    w1q = w1.astype(jnp.bfloat16).astype(jnp.float32)
    h_ref = xq @ w1q + b1
    h_ref = jnp.where(h_ref >= 0, h_ref, NEG_SLOPE * h_ref)
    ref = jax.nn.softmax(h_ref @ w2 + b2, axis=1)

    assert out.shape == (B, NUM_CLASSES)
    assert bool(jnp.all(jnp.isfinite(out)))
    assert jnp.allclose(jnp.sum(out, axis=1), 1.0, atol=1e-4)   # exact divide -> f32 rounding only
    assert jnp.allclose(out, ref, atol=2e-3, rtol=2e-3)
    print("KERNEL_OK")
</pallas_src>

<mosaic_0001>
module attributes {stable_mosaic.version = 11 : i64} {
  func.func @mlp_kernel(%arg0: i32, %arg1: memref<16x784xf32, #tpu.memory_space<vmem>>, %arg2: memref<784x896xbf16, #tpu.memory_space<vmem>>, %arg3: memref<1x896xf32, #tpu.memory_space<vmem>>, %arg4: memref<896x128xf32, #tpu.memory_space<vmem>>, %arg5: memref<1x128xf32, #tpu.memory_space<vmem>>, %arg6: memref<16x128xf32, #tpu.memory_space<vmem>>) attributes {dimension_semantics = [#tpu.dimension_semantics<parallel>], iteration_bounds = array<i64: 1>, scalar_prefetch = 0 : i64, scratch_operands = 0 : i64, tpu.core_type = #tpu.core_type<tc>, window_params = [{transform_indices = @transform_0, window_bounds = array<i64: 16, 784>}, {pipeline_mode = #tpu.pipeline_mode<synchronous>, transform_indices = @transform_1, window_bounds = array<i64: 784, 896>}, {pipeline_mode = #tpu.pipeline_mode<synchronous>, transform_indices = @transform_2, window_bounds = array<i64: 1, 896>}, {pipeline_mode = #tpu.pipeline_mode<synchronous>, transform_indices = @transform_3, window_bounds = array<i64: 896, 128>}, {pipeline_mode = #tpu.pipeline_mode<synchronous>, transform_indices = @transform_4, window_bounds = array<i64: 1, 128>}, {transform_indices = @transform_5, window_bounds = array<i64: 16, 128>}]} {
    %c0 = arith.constant 0 : index
    %c0_0 = arith.constant 0 : index
    %0 = vector.load %arg1[%c0, %c0_0] : memref<16x784xf32, #tpu.memory_space<vmem>>, vector<16x784xf32>
    %1 = arith.truncf %0 : vector<16x784xf32> to vector<16x784xbf16>
    %c0_1 = arith.constant 0 : index
    %c0_2 = arith.constant 0 : index
    %2 = vector.load %arg2[%c0_1, %c0_2] : memref<784x896xbf16, #tpu.memory_space<vmem>>, vector<784x896xbf16>
    %cst = arith.constant dense<0.000000e+00> : vector<16x896xf32>
    %3 = tpu.matmul %1, %2, %cst {dimension_numbers = #tpu.dot_dimension_numbers<[1], [0], [0], [1], [0, 0, 1, 1], [], []>} : vector<16x784xbf16>, vector<784x896xbf16>, vector<16x896xf32> -> vector<16x896xf32>
    %c0_3 = arith.constant 0 : index
    %c0_4 = arith.constant 0 : index
    %4 = vector.load %arg3[%c0_3, %c0_4] : memref<1x896xf32, #tpu.memory_space<vmem>>, vector<1x896xf32>
    %5 = vector.broadcast %4 : vector<1x896xf32> to vector<16x896xf32>
    %6 = arith.addf %3, %5 : vector<16x896xf32>
    %cst_5 = arith.constant 2.000000e-01 : f32
    %7 = vector.broadcast %cst_5 : f32 to vector<16x896xf32>
    %8 = arith.mulf %7, %6 : vector<16x896xf32>
    %9 = arith.maximumf %6, %8 : vector<16x896xf32>
    %c0_6 = arith.constant 0 : index
    %c0_7 = arith.constant 0 : index
    %10 = vector.load %arg4[%c0_6, %c0_7] : memref<896x128xf32, #tpu.memory_space<vmem>>, vector<896x128xf32>
    %cst_8 = arith.constant dense<0.000000e+00> : vector<16x128xf32>
    %11 = tpu.matmul %9, %10, %cst_8 {dimension_numbers = #tpu.dot_dimension_numbers<[1], [0], [0], [1], [0, 0, 1, 1], [], []>} : vector<16x896xf32>, vector<896x128xf32>, vector<16x128xf32> -> vector<16x128xf32>
    %c0_9 = arith.constant 0 : index
    %c0_10 = arith.constant 0 : index
    %12 = vector.load %arg5[%c0_9, %c0_10] : memref<1x128xf32, #tpu.memory_space<vmem>>, vector<1x128xf32>
    %13 = vector.broadcast %12 : vector<1x128xf32> to vector<16x128xf32>
    %14 = arith.addf %11, %13 : vector<16x128xf32>
    %cst_11 = arith.constant dense<0xFF800000> : vector<16xf32>
    %15 = vector.multi_reduction <maximumf>, %14, %cst_11 [1] : vector<16x128xf32> to vector<16xf32>
    %16 = vector.shape_cast %15 : vector<16xf32> to vector<16x1xf32>
    %17 = vector.broadcast %16 : vector<16x1xf32> to vector<16x128xf32>
    %18 = arith.subf %14, %17 : vector<16x128xf32>
    %19 = math.exp %18 : vector<16x128xf32>
    %cst_12 = arith.constant dense<0.000000e+00> : vector<16xf32>
    %20 = vector.multi_reduction <add>, %19, %cst_12 [1] : vector<16x128xf32> to vector<16xf32>
    %21 = vector.shape_cast %20 : vector<16xf32> to vector<16x1xf32>
    %22 = vector.broadcast %21 : vector<16x1xf32> to vector<16x128xf32>
    %23 = arith.divf %19, %22 : vector<16x128xf32>
    %c0_13 = arith.constant 0 : index
    %c0_14 = arith.constant 0 : index
    %24 = vector.load %arg6[%c0_13, %c0_14] : memref<16x128xf32, #tpu.memory_space<vmem>>, vector<16x128xf32>
    tpu.vector_store %arg6[%c0_13, %c0_14], %23 {strides = array<i32>} : memref<16x128xf32, #tpu.memory_space<vmem>>, vector<16x128xf32>,
    return
  }
  func.func @transform_0(%arg0: i32) -> (i32, i32) {
    %c0_i32 = arith.constant 0 : i32
    %c0_i32_0 = arith.constant 0 : i32
    return %arg0, %c0_i32 : i32, i32
  }
  func.func @transform_1(%arg0: i32) -> (i32, i32) {
    %c0_i32 = arith.constant 0 : i32
    %c0_i32_0 = arith.constant 0 : i32
    %c0_i32_1 = arith.constant 0 : i32
    return %c0_i32, %c0_i32_0 : i32, i32
  }
  func.func @transform_2(%arg0: i32) -> (i32, i32) {
    %c0_i32 = arith.constant 0 : i32
    %c0_i32_0 = arith.constant 0 : i32
    %c0_i32_1 = arith.constant 0 : i32
    return %c0_i32, %c0_i32_0 : i32, i32
  }
  func.func @transform_3(%arg0: i32) -> (i32, i32) {
    %c0_i32 = arith.constant 0 : i32
    %c0_i32_0 = arith.constant 0 : i32
    %c0_i32_1 = arith.constant 0 : i32
    return %c0_i32, %c0_i32_0 : i32, i32
  }
  func.func @transform_4(%arg0: i32) -> (i32, i32) {
    %c0_i32 = arith.constant 0 : i32
    %c0_i32_0 = arith.constant 0 : i32
    %c0_i32_1 = arith.constant 0 : i32
    return %c0_i32, %c0_i32_0 : i32, i32
  }
  func.func @transform_5(%arg0: i32) -> (i32, i32) {
    %c0_i32 = arith.constant 0 : i32
    %c0_i32_0 = arith.constant 0 : i32
    return %arg0, %c0_i32 : i32, i32
  }
}

</mosaic_0001>

<bundles_post_ra>
// kernel: net_forward.1
= control target key start
LH: loop header
LB: loop body
LE: loop exit
PB: predicated region body
PF: predicated region fallthrough
CT: control target
= control target key end

     0   :  { %10 = vsyncpa [#allocation3], 0  ;;  %s5102_s0 = inlined_call_operand.hbm [shape: f32[8,784], index: 0, kind: input, shape index: {}]   ;;  %s5103_s1 = inlined_call_operand.hbm [shape: bf16[784,896], index: 1, kind: input, shape index: {}]   ;;  %s5104_s2 = inlined_call_operand.hbm [shape: f32[1,896], index: 2, kind: input, shape index: {}]   ;;  %s5105_s3 = inlined_call_operand.hbm [shape: f32[896,128], index: 3, kind: input, shape index: {}]   ;;  %s5106_s4 = inlined_call_operand.hbm [shape: f32[1,128], index: 4, kind: input, shape index: {}]   ;;  %s5107_s5 = inlined_call_operand.hbm [shape: f32[8,128], index: 5, kind: output, shape index: {}]  }
   0x1   :  { %11 = vsyncpa [#allocation6], 0 }
   0x2   :  { %12 = vsyncpa [#allocation9], 0 }
   0x3   :  { %13 = vsyncpa [#allocation4], 0 }
   0x4   :  { %18 = vsyncadd [#allocation3], 896  ;;  %s4888_s18 = smov [#allocation5]   ;;  %s4748_s22 = scalar_lea.hbm %s5103_s1, 43904 }
   0x5   :  { %s31_s19 = sshll.u32 %s4888_s18, 4  ;;  %p4749_p0 = scmp.ne.s32.totalorder %s5103_s1, %s4748_s22  ;;  %s32_s19 = int_to_ptr.vmem [resolvable:$true] %s31_s19 }
   0x6   :  { %p4752_p1 = scmp.lt.u32.totalorder %s4748_s22, %s5103_s1 }
   0x8   :  { %p4754_p2 = pnand %p4752_p1, %p4749_p0 }
   0xa   :  { %4757 = shalt.err (!%p4754_p2)
}
   0xb   :  { %s4758_s27 = scalar_lea.vmem %s32_s19, 43904  ;;  %p4763_p4 = scmp.lt.s32.totalorder %s32_s19, %s32_s19 }
   0xc   :  { %p4759_p3 = scmp.ne.s32.totalorder %s32_s19, %s4758_s27  ;;  %p4764_p5 = scmp.lt.s32.totalorder %s4758_s27, %s4758_s27 }
   0xe   :  { %p4765_p6 = por %p4764_p5, %p4763_p4 }
  0x10   :  { %p4766_p7 = pnand %p4765_p6, %p4759_p3 }
  0x12   :  { %4769 = shalt.err (!%p4766_p7)
}
  0x13   :  { %s4889_s28 = smov 448   ;;  %s4890_s29 = smov 28  }
  0x14   :  { %37 = dma.hbm_to_vmem [thread:$0]  %s5103_s1, 43904, %s32_s19, [#allocation6], %s4889_s28, %s4889_s28, %s4890_s29  }
  0x15   :  { %s4891_s7 = smov [#allocation8]   ;;  %s4770_s11 = scalar_lea.hbm %s5105_s3, 14336 }
  0x16   :  { %s53_s8 = sshll.u32 %s4891_s7, 4  ;;  %p4771_p8 = scmp.ne.s32.totalorder %s5105_s3, %s4770_s11  ;;  %s54_s8 = int_to_ptr.vmem [resolvable:$true] %s53_s8 }
  0x17   :  { %p4774_p9 = scmp.lt.u32.totalorder %s4770_s11, %s5105_s3 }
  0x19   :  { %p4776_p10 = pnand %p4774_p9, %p4771_p8 }
  0x1b   :  { %4779 = shalt.err (!%p4776_p10)
}
  0x1c   :  { %s4780_s16 = scalar_lea.vmem %s54_s8, 14336  ;;  %p4785_p12 = scmp.lt.s32.totalorder %s54_s8, %s54_s8 }
  0x1d   :  { %p4781_p11 = scmp.ne.s32.totalorder %s54_s8, %s4780_s16  ;;  %p4786_p13 = scmp.lt.s32.totalorder %s4780_s16, %s4780_s16 }
  0x1f   :  { %p4787_p0 = por %p4786_p13, %p4785_p12 }
  0x21   :  { %p4788_p1 = pnand %p4787_p0, %p4781_p11 }
  0x23   :  { %4791 = shalt.err (!%p4788_p1)
}
  0x24   :  { %s4892_s1 = smov 128   ;;  %s4893_s17 = smov 8  }
  0x25   :  { %59 = dma.hbm_to_vmem [thread:$0]  %s5105_s3, 14336, %s54_s8, [#allocation9], %s4892_s1, %s4892_s1, %s4893_s17  }
  0x26   :  { %s4894_s20 = smov [#allocation2]   ;;  %s4792_s24 = scalar_lea.hbm %s5102_s0, 896 }
  0x27   :  { %s19_s21 = sshll.u32 %s4894_s20, 4  ;;  %p4793_p2 = scmp.ne.s32.totalorder %s5102_s0, %s4792_s24  ;;  %s20_s21 = int_to_ptr.vmem [resolvable:$true] %s19_s21 }
  0x28   :  { %p4796_p3 = scmp.lt.u32.totalorder %s4792_s24, %s5102_s0 }
  0x2a   :  { %p4798_p4 = pnand %p4796_p3, %p4793_p2 }
  0x2c   :  { %4801 = shalt.err (!%p4798_p4)
}
  0x2d   :  { %s4802_s29 = scalar_lea.vmem %s20_s21, 896  ;;  %s4806_s3 = scalar_lea.vmem %s20_s21, 1792 }
  0x2e   :  { %p4803_p5 = scmp.ne.s32.totalorder %s20_s21, %s4802_s29  ;;  %p4807_p6 = scmp.lt.s32.totalorder %s20_s21, %s20_s21 }
  0x2f   :  { %p4808_p7 = scmp.lt.s32.totalorder %s4806_s3, %s4802_s29 }
  0x31   :  { %p4809_p8 = por %p4808_p7, %p4807_p6 }
  0x33   :  { %p4810_p9 = pnand %p4809_p8, %p4803_p5 }
  0x35   :  { %4813 = shalt.err (!%p4810_p9)
}
  0x36   :  { %s4895_s30 = smov 896   ;;  %s4896_s6 = smov 56  }
  0x37   :  { %25 = dma.hbm_to_vmem [thread:$0]  %s5102_s0, 896, %s20_s21, [#allocation3], %s4895_s30, %s4895_s30, %s4896_s6  }
  0x38   :  { %s4897_s9 = smov [#allocation7]   ;;  %s4898_s11 = smov [#allocation10]  }
  0x39   :  { %s44_s10 = sshll.u32 %s4897_s9, 4  ;;  %s66_s12 = sshll.u32 %s4898_s11, 4  ;;  %s45_s10 = int_to_ptr.vmem [resolvable:$true] %s44_s10  ;;  %s67_s12 = int_to_ptr.vmem [resolvable:$true] %s66_s12 }
  0x3a   :  { %s4814_s15 = scalar_lea.hbm %s5104_s2, 112 }
  0x3b   :  { %p4815_p10 = scmp.ne.s32.totalorder %s5104_s2, %s4814_s15  ;;  %p4818_p11 = scmp.lt.u32.totalorder %s4814_s15, %s5104_s2 }
  0x3d   :  { %p4820_p12 = pnand %p4818_p11, %p4815_p10 }
  0x3f   :  { %4823 = shalt.err (!%p4820_p12)
}
  0x40   :  { %s4824_s0 = scalar_lea.vmem %s45_s10, 112  ;;  %s4828_s21 = scalar_lea.vmem %s45_s10, 128 }
  0x41   :  { %p4825_p13 = scmp.ne.s32.totalorder %s45_s10, %s4824_s0  ;;  %p4829_p0 = scmp.lt.s32.totalorder %s45_s10, %s45_s10 }
  0x42   :  { %p4830_p1 = scmp.lt.s32.totalorder %s4828_s21, %s4824_s0 }
  0x44   :  { %p4831_p2 = por %p4830_p1, %p4829_p0 }
  0x46   :  { %p4832_p3 = pnand %p4831_p2, %p4825_p13 }
  0x48   :  { %4835 = shalt.err (!%p4832_p3)
}
  0x49   :  { %47 = dma.hbm_to_vmem [thread:$0]  %s5104_s2, 112, %s45_s10, [#allocation6]  }
  0x4a   :  { %s4836_s26 = scalar_lea.hbm %s5106_s4, 16 }
  0x4b   :  { %p4837_p4 = scmp.ne.s32.totalorder %s5106_s4, %s4836_s26  ;;  %p4840_p5 = scmp.lt.u32.totalorder %s4836_s26, %s5106_s4 }
  0x4d   :  { %p4842_p6 = pnand %p4840_p5, %p4837_p4 }
  0x4f   :  { %4845 = shalt.err (!%p4842_p6)
}
  0x50   :  { %s4846_s30 = scalar_lea.vmem %s67_s12, 16  ;;  %s4850_s6 = scalar_lea.vmem %s67_s12, 32 }
  0x51   :  { %p4847_p7 = scmp.ne.s32.totalorder %s67_s12, %s4846_s30  ;;  %p4851_p8 = scmp.lt.s32.totalorder %s67_s12, %s67_s12 }
  0x52   :  { %p4852_p9 = scmp.lt.s32.totalorder %s4850_s6, %s4846_s30 }
  0x54   :  { %p4853_p10 = por %p4852_p9, %p4851_p8 }
  0x56   :  { %p4854_p11 = pnand %p4853_p10, %p4847_p7 }
  0x58   :  { %4857 = shalt.err (!%p4854_p11)
}
  0x59   :  { %69 = dma.hbm_to_vmem [thread:$0]  %s5106_s4, 16, %s67_s12, [#allocation9]  }
  0x5a   :  { %4880 = dma.done.wait [#allocation3], 1792  }
  0x5b   :  { %4881 = vsyncadd [#allocation3], 4294965504 }
  0x5c   :  { %4882 = dma.done.wait [#allocation6], 44016  }
  0x5d   :  { %4883 = vsyncadd [#allocation6], 4294923280 }
  0x5e   :  { %4884 = dma.done.wait [#allocation9], 14352  }
  0x5f   :  { %4885 = vsyncadd [#allocation9], 4294952944  ;;  %v4899_v0 = vmov 0   ;;  %v4250_v1 = vld [vmem:[#allocation5 + $0x4] ss:$28 sps:$4 sm:$0xff]   ;;  %v99_v10 = vld [vmem:[#allocation2 + $0x68] sm:$0xff] }
  0x60   :  { %2465 = vmatprep.mubr.bf16.mxu1 %v4899_v0  ;;  %v4252_v2 = vld [vmem:[#allocation5 + $0xa84] ss:$28 sps:$4 sm:$0xff]   ;;  %2304 = vmatprep.subr.bf16.mxu0 %v4250_v1  ;;  %v4256_v5 = vld [vmem:[#allocation5 + $0x3c] ss:$28 sps:$4 sm:$0xff]   ;;  %v4260_v7 = vld [vmem:[#allocation5 + $0xc] ss:$28 sps:$4 sm:$0xff]  }
  0x61   :  { %v4254_v3 = vld [vmem:[#allocation5] ss:$28 sps:$4 sm:$0xff]   ;;  %2433 = vmatprep.subr.bf16.mxu1 %v4252_v2  ;;  %v4258_v6 = vld [vmem:[#allocation5 + $0x8] ss:$28 sps:$4 sm:$0xff]   ;;  %v4261_v8 = vld [vmem:[#allocation5 + $0x38] ss:$28 sps:$4 sm:$0xff]  }
  0x62   :  { %v4255_v4 = vld [vmem:[#allocation5 + $0xa80] ss:$28 sps:$4 sm:$0xff]   ;;  %2305 = vmatpush1.bf16.msra.mxu0 %v4254_v3  ;;  %vm2300_vm0 = vcmask 130048   ;;  %v4262_v12 = vld [vmem:[#allocation5 + $0x74] ss:$28 sps:$4 sm:$0xff]   ;;  %vm4901_vm1 = vmmov 0  }
  0x63   :  { %2434 = vmatpush1.bf16.msra.mxu1 %v4255_v4  ;;  %2306 = vmatprep.subr.bf16.mxu0 %v4256_v5  ;;  %v92_v9 = vld [vmem:[#allocation2 + $0x30] sm:$0xff]  ;;  %v4267_v15 = vld [vmem:[#allocation5 + $0x70] ss:$28 sps:$4 sm:$0xff]   ;;  %v4272_v17 = vld [vmem:[#allocation5 + $0x7c] ss:$28 sps:$4 sm:$0xff]  }
  0x64   :  { %2476 = vmatprep.subr.bf16.mxu1 %v4260_v7  ;;  %v4997_v11 = vpack.c.bf16 %v99_v10, %v92_v9  ;;  %v4264_v13 = vld [vmem:[#allocation5 + $0x40] ss:$28 sps:$4 sm:$0xff]   ;;  %v4268_v16 = vld [vmem:[#allocation5 + $0xac] ss:$28 sps:$4 sm:$0xff]   ;;  %v4270_v19 = vld [vmem:[#allocation5 + $0x78] ss:$28 sps:$4 sm:$0xff]  }
  0x65   :  { %v4266_v14 = vld [vmem:[#allocation5 + $0x44] ss:$28 sps:$4 sm:$0xff]   ;;  %v4278_v21 = vld [vmem:[#allocation5 + $0xb4] ss:$28 sps:$4 sm:$0xff]   ;;  %v4280_v24 = vld [vmem:[#allocation5 + $0x11c] ss:$28 sps:$4 sm:$0xff]  }
  0x66   :  { %2307 = vmatpush1.bf16.msra.mxu0 %v4261_v8  ;;  %3813 = vmatmul.mubr.msk.bf16.vlgmr.msra.gmra.mrb[0].mxu1 %vm2300_vm0, %v4997_v11  ;;  %v4273_v18 = vld [vmem:[#allocation5 + $0xa8] ss:$28 sps:$4 sm:$0xff]   ;;  %v4276_v22 = vld [vmem:[#allocation5 + $0xb0] ss:$28 sps:$4 sm:$0xff]   ;;  %v4279_v23 = vld [vmem:[#allocation5 + $0xe0] ss:$28 sps:$4 sm:$0xff]  }
  0x67   :  { %2477 = vmatpush1.bf16.msra.mxu1 %v4258_v6  ;;  %2308 = vmatprep.subr.bf16.mxu0 %v4262_v12  ;;  %v4274_v20 = vld [vmem:[#allocation5 + $0xe4] ss:$28 sps:$4 sm:$0xff]   ;;  %v4284_v25 = vld [vmem:[#allocation5 + $0xec] ss:$28 sps:$4 sm:$0xff]   ;;  %v4285_v26 = vld [vmem:[#allocation5 + $0x118] ss:$28 sps:$4 sm:$0xff]  }
  0x68   :  { %2478 = vmatprep.subr.bf16.mxu1 %v4266_v14  ;;  %v4282_v27 = vld [vmem:[#allocation5 + $0xe8] ss:$28 sps:$4 sm:$0xff]   ;;  %v4286_v28 = vld [vmem:[#allocation5 + $0x154] ss:$28 sps:$4 sm:$0xff]   ;;  %v4288_v30 = vld [vmem:[#allocation5 + $0x120] ss:$28 sps:$4 sm:$0xff]  }
  0x69   :  { %v4290_v29 = vld [vmem:[#allocation5 + $0x124] ss:$28 sps:$4 sm:$0xff]   ;;  %v4291_v31 = vld [vmem:[#allocation5 + $0x150] ss:$28 sps:$4 sm:$0xff]   ;;  %v4296_v33 = vld [vmem:[#allocation5 + $0x15c] ss:$28 sps:$4 sm:$0xff]  }
  0x6a   :  { %2309 = vmatpush1.bf16.msra.mxu0 %v4267_v15  ;;  %v4292_v32 = vld [vmem:[#allocation5 + $0x18c] ss:$28 sps:$4 sm:$0xff]   ;;  %v4294_v35 = vld [vmem:[#allocation5 + $0x158] ss:$28 sps:$4 sm:$0xff]   ;;  %v4298_v36 = vld [vmem:[#allocation5 + $0x1c4] ss:$28 sps:$4 sm:$0xff]  }
  0x6b   :  { %2479 = vmatpush1.bf16.msra.mxu1 %v4264_v13  ;;  %2310 = vmatprep.subr.bf16.mxu0 %v4268_v16  ;;  %v4297_v34 = vld [vmem:[#allocation5 + $0x188] ss:$28 sps:$4 sm:$0xff]   ;;  %v4302_v37 = vld [vmem:[#allocation5 + $0x194] ss:$28 sps:$4 sm:$0xff]   ;;  %v4303_v39 = vld [vmem:[#allocation5 + $0x1c0] ss:$28 sps:$4 sm:$0xff]  }
  0x6c   :  { %2480 = vmatprep.subr.bf16.mxu1 %v4272_v17  ;;  %v4300_v38 = vld [vmem:[#allocation5 + $0x190] ss:$28 sps:$4 sm:$0xff]   ;;  %v4304_v40 = vld [vmem:[#allocation5 + $0x1fc] ss:$28 sps:$4 sm:$0xff]   ;;  %v4306_v43 = vld [vmem:[#allocation5 + $0x1c8] ss:$28 sps:$4 sm:$0xff]  }
  0x6d   :  { %v4308_v41 = vld [vmem:[#allocation5 + $0x1cc] ss:$28 sps:$4 sm:$0xff]   ;;  %v4309_v42 = vld [vmem:[#allocation5 + $0x1f8] ss:$28 sps:$4 sm:$0xff]   ;;  %v4314_v45 = vld [vmem:[#allocation5 + $0x204] ss:$28 sps:$4 sm:$0xff]  }
  0x6e   :  { %2311 = vmatpush1.bf16.msra.mxu0 %v4273_v18  ;;  %v4310_v44 = vld [vmem:[#allocation5 + $0x234] ss:$28 sps:$4 sm:$0xff]   ;;  %v4312_v46 = vld [vmem:[#allocation5 + $0x200] ss:$28 sps:$4 sm:$0xff]   ;;  %v4316_v48 = vld [vmem:[#allocation5 + $0x26c] ss:$28 sps:$4 sm:$0xff]  }
  0x6f   :  { %2481 = vmatpush1.bf16.msra.mxu1 %v4270_v19  ;;  %2312 = vmatprep.subr.bf16.mxu0 %v4274_v20  ;;  %v4315_v47 = vld [vmem:[#allocation5 + $0x230] ss:$28 sps:$4 sm:$0xff]   ;;  %v4320_v49 = vld [vmem:[#allocation5 + $0x23c] ss:$28 sps:$4 sm:$0xff]   ;;  %v4321_v53 = vld [vmem:[#allocation5 + $0x268] ss:$28 sps:$4 sm:$0xff]  }
  0x70   :  { %2482 = vmatprep.subr.bf16.mxu1 %v4278_v21  ;;  %v4318_v50 = vld [vmem:[#allocation5 + $0x238] ss:$28 sps:$4 sm:$0xff]   ;;  %v4322_v55 = vld [vmem:[#allocation5 + $0x2a4] ss:$28 sps:$4 sm:$0xff]   ;;  %v4324_v58 = vld [vmem:[#allocation5 + $0x270] ss:$28 sps:$4 sm:$0xff]  }
  0x71   :  { %v87_v51 = vld [vmem:[#allocation2 + $0x8] sm:$0xff]  ;;  %v94_v52 = vld [vmem:[#allocation2 + $0x40] sm:$0xff]  ;;  %v4332_v60 = vld [vmem:[#allocation5 + $0x2ac] ss:$28 sps:$4 sm:$0xff]  }
  0x72   :  { %2313 = vmatpush1.bf16.msra.mxu0 %v4279_v23  ;;  %v5001_v54 = vpack.c.bf16 %v94_v52, %v87_v51  ;;  %v4326_v56 = vld [vmem:[#allocation5 + $0x274] ss:$28 sps:$4 sm:$0xff]   ;;  %v4327_v57 = vld [vmem:[#allocation5 + $0x2a0] ss:$28 sps:$4 sm:$0xff]   ;;  %v4330_v62 = vld [vmem:[#allocation5 + $0x2a8] ss:$28 sps:$4 sm:$0xff]  }
  0x73   :  { %2483 = vmatpush1.bf16.msra.mxu1 %v4276_v22  ;;  %2314 = vmatprep.subr.bf16.mxu0 %v4280_v24  ;;  %v4328_v59 = vld [vmem:[#allocation5 + $0x2dc] ss:$28 sps:$4 sm:$0xff]   ;;  %v4334_v63 = vld [vmem:[#allocation5 + $0x314] ss:$28 sps:$4 sm:$0xff]   ;;  %v4338_v1 = vld [vmem:[#allocation5 + $0x2e4] ss:$28 sps:$4 sm:$0xff]  }
  0x74   :  { %2484 = vmatprep.subr.bf16.mxu1 %v4284_v25  ;;  %2336 = vmatprep.mubr.bf16.mxu0 %v5001_v54  ;;  %v4333_v61 = vld [vmem:[#allocation5 + $0x2d8] ss:$28 sps:$4 sm:$0xff]   ;;  %v4339_v2 = vld [vmem:[#allocation5 + $0x310] ss:$28 sps:$4 sm:$0xff]   ;;  %v4336_v3 = vld [vmem:[#allocation5 + $0x2e0] ss:$28 sps:$4 sm:$0xff]  }
  0x75   :  { %2508 = vmatprep.mubr.bf16.mxu1 %v5001_v54  ;;  %v4340_v4 = vld [vmem:[#allocation5 + $0x34c] ss:$28 sps:$4 sm:$0xff]   ;;  %v4344_v5 = vld [vmem:[#allocation5 + $0x31c] ss:$28 sps:$4 sm:$0xff]   ;;  %v86_v7 = vld [vmem:[#allocation2] sm:$0xff] }
  0x76   :  { %2315 = vmatpush1.bf16.msra.mxu0 %v4285_v26  ;;  %v4345_v6 = vld [vmem:[#allocation5 + $0x348] ss:$28 sps:$4 sm:$0xff]   ;;  %v4342_v9 = vld [vmem:[#allocation5 + $0x318] ss:$28 sps:$4 sm:$0xff]   ;;  %v4346_v14 = vld [vmem:[#allocation5 + $0x380] ss:$28 sps:$4 sm:$0xff]  }
  0x77   :  { %2485 = vmatpush1.bf16.msra.mxu1 %v4282_v27  ;;  %2316 = vmatprep.subr.bf16.mxu0 %v4286_v28  ;;  %v93_v8 = vld [vmem:[#allocation2 + $0x38] sm:$0xff]  ;;  %v4348_v10 = vld [vmem:[#allocation5 + $0x384] ss:$28 sps:$4 sm:$0xff]   ;;  %v4351_v12 = vld [vmem:[#allocation5 + $0x354] ss:$28 sps:$4 sm:$0xff]  }
  0x78   :  { %2486 = vmatprep.subr.bf16.mxu1 %v4290_v29  ;;  %v5005_v13 = vpack.c.bf16 %v93_v8, %v86_v7  ;;  %v4349_v15 = vld [vmem:[#allocation5 + $0x350] ss:$28 sps:$4 sm:$0xff]   ;;  %v4354_v16 = vld [vmem:[#allocation5 + $0x3bc] ss:$28 sps:$4 sm:$0xff]   ;;  %v4355_v19 = vld [vmem:[#allocation5 + $0x388] ss:$28 sps:$4 sm:$0xff]  }
  0x79   :  { %v4357_v17 = vld [vmem:[#allocation5 + $0x38c] ss:$28 sps:$4 sm:$0xff]   ;;  %v4352_v18 = vld [vmem:[#allocation5 + $0x3b8] ss:$28 sps:$4 sm:$0xff]   ;;  %v4363_v21 = vld [vmem:[#allocation5 + $0x3c4] ss:$28 sps:$4 sm:$0xff]  }
  0x7a   :  { %2317 = vmatpush1.bf16.msra.mxu0 %v4291_v31  ;;  %v4360_v20 = vld [vmem:[#allocation5 + $0x3f4] ss:$28 sps:$4 sm:$0xff]   ;;  %v4361_v23 = vld [vmem:[#allocation5 + $0x3c0] ss:$28 sps:$4 sm:$0xff]   ;;  %v4366_v24 = vld [vmem:[#allocation5 + $0x42c] ss:$28 sps:$4 sm:$0xff]  }
  0x7b   :  { %2487 = vmatpush1.bf16.msra.mxu1 %v4288_v30  ;;  %2318 = vmatprep.subr.bf16.mxu0 %v4292_v32  ;;  %v4358_v22 = vld [vmem:[#allocation5 + $0x3f0] ss:$28 sps:$4 sm:$0xff]   ;;  %v4369_v25 = vld [vmem:[#allocation5 + $0x3fc] ss:$28 sps:$4 sm:$0xff]   ;;  %v4364_v26 = vld [vmem:[#allocation5 + $0x428] ss:$28 sps:$4 sm:$0xff]  }
  0x7c   :  { %2488 = vmatprep.subr.bf16.mxu1 %v4296_v33  ;;  %v4367_v27 = vld [vmem:[#allocation5 + $0x3f8] ss:$28 sps:$4 sm:$0xff]   ;;  %v4372_v28 = vld [vmem:[#allocation5 + $0x464] ss:$28 sps:$4 sm:$0xff]   ;;  %v4373_v31 = vld [vmem:[#allocation5 + $0x430] ss:$28 sps:$4 sm:$0xff]  }
  0x7d   :  { %v4375_v29 = vld [vmem:[#allocation5 + $0x434] ss:$28 sps:$4 sm:$0xff]   ;;  %v4370_v30 = vld [vmem:[#allocation5 + $0x460] ss:$28 sps:$4 sm:$0xff]   ;;  %v4381_v33 = vld [vmem:[#allocation5 + $0x46c] ss:$28 sps:$4 sm:$0xff]  }
  0x7e   :  { %2319 = vmatpush1.bf16.msra.mxu0 %v4297_v34  ;;  %v4378_v32 = vld [vmem:[#allocation5 + $0x49c] ss:$28 sps:$4 sm:$0xff]   ;;  %v4405_v52 = vld [vmem:[#allocation5 + $0x54c] ss:$28 sps:$4 sm:$0xff]  }
  0x7f   :  { %2489 = vmatpush1.bf16.msra.mxu1 %v4294_v35  ;;  %2320 = vmatprep.subr.bf16.mxu0 %v4298_v36  ;;  %v4376_v34 = vld [vmem:[#allocation5 + $0x498] ss:$28 sps:$4 sm:$0xff]   ;;  %v4379_v35 = vld [vmem:[#allocation5 + $0x468] ss:$28 sps:$4 sm:$0xff]  }
  0x80   :  { %2490 = vmatprep.subr.bf16.mxu1 %v4302_v37  ;;  %v4384_v36 = vld [vmem:[#allocation5 + $0x4d4] ss:$28 sps:$4 sm:$0xff]   ;;  %v4387_v37 = vld [vmem:[#allocation5 + $0x4a4] ss:$28 sps:$4 sm:$0xff]   ;;  %v4402_v51 = vld [vmem:[#allocation5 + $0x57c] ss:$28 sps:$4 sm:$0xff]  }
  0x81   :  { %v4424_v7 = vld [vmem:[#allocation5 + $0x658] ss:$28 sps:$4 sm:$0xff]   ;;  %v4427_v8 = vld [vmem:[#allocation5 + $0x628] ss:$28 sps:$4 sm:$0xff]  }
  0x82   :  { %2321 = vmatpush1.bf16.msra.mxu0 %v4303_v39  ;;  %v89_v39 = vld [vmem:[#allocation2 + $0x18] sm:$0xff] }
  0x83   :  { %2491 = vmatpush1.bf16.msra.mxu1 %v4300_v38  ;;  %2322 = vmatprep.subr.bf16.mxu0 %v4304_v40  ;;  %v4382_v38 = vld [vmem:[#allocation5 + $0x4d0] ss:$28 sps:$4 sm:$0xff]   ;;  %v96_v40 = vld [vmem:[#allocation2 + $0x50] sm:$0xff] }
  0x84   :  { %2492 = vmatprep.subr.bf16.mxu1 %v4308_v41  ;;  %v4385_v41 = vld [vmem:[#allocation5 + $0x4a0] ss:$28 sps:$4 sm:$0xff]  }
  0x86   :  { %2323 = vmatpush1.bf16.msra.mxu0 %v4309_v42  ;;  %v5009_v42 = vpack.c.bf16 %v96_v40, %v89_v39  ;;  %v4460_v39 = vld [vmem:[#allocation5 + $0x7a8] ss:$28 sps:$4 sm:$0xff]   ;;  %v4463_v40 = vld [vmem:[#allocation5 + $0x778] ss:$28 sps:$4 sm:$0xff]  }
  0x87   :  { %2493 = vmatpush1.bf16.msra.mxu1 %v4306_v43  ;;  %2324 = vmatprep.subr.bf16.mxu0 %v4310_v44  ;;  %v4390_v43 = vld [vmem:[#allocation5 + $0x50c] ss:$28 sps:$4 sm:$0xff]   ;;  %v4393_v44 = vld [vmem:[#allocation5 + $0x4dc] ss:$28 sps:$4 sm:$0xff]  }
  0x88   :  { %2494 = vmatprep.subr.bf16.mxu1 %v4314_v45  ;;  %v4388_v45 = vld [vmem:[#allocation5 + $0x508] ss:$28 sps:$4 sm:$0xff]  }
  0x8a   :  { %2325 = vmatpush1.bf16.msra.mxu0 %v4315_v47  ;;  %v4396_v47 = vld [vmem:[#allocation5 + $0x544] ss:$28 sps:$4 sm:$0xff]  }
  0x8b   :  { %2495 = vmatpush1.bf16.msra.mxu1 %v4312_v46  ;;  %2326 = vmatprep.subr.bf16.mxu0 %v4316_v48  ;;  %v4391_v46 = vld [vmem:[#allocation5 + $0x4d8] ss:$28 sps:$4 sm:$0xff]  }
  0x8c   :  { %2496 = vmatprep.subr.bf16.mxu1 %v4320_v49  ;;  %v4399_v48 = vld [vmem:[#allocation5 + $0x514] ss:$28 sps:$4 sm:$0xff]   ;;  %v4394_v49 = vld [vmem:[#allocation5 + $0x540] ss:$28 sps:$4 sm:$0xff]  }
  0x8e   :  { %2327 = vmatpush1.bf16.msra.mxu0 %v4321_v53  ;;  %v4400_v53 = vld [vmem:[#allocation5 + $0x578] ss:$28 sps:$4 sm:$0xff]  }
  0x8f   :  { %2497 = vmatpush1.bf16.msra.mxu1 %v4318_v50  ;;  %2328 = vmatprep.subr.bf16.mxu0 %v4322_v55  ;;  %v4397_v50 = vld [vmem:[#allocation5 + $0x510] ss:$28 sps:$4 sm:$0xff]   ;;  %v4403_v55 = vld [vmem:[#allocation5 + $0x548] ss:$28 sps:$4 sm:$0xff]  }
  0x90   :  { %2498 = vmatprep.subr.bf16.mxu1 %v4326_v56  ;;  %v4408_v56 = vld [vmem:[#allocation5 + $0x5b4] ss:$28 sps:$4 sm:$0xff]  }
  0x92   :  { %2329 = vmatpush1.bf16.msra.mxu0 %v4327_v57  ;;  %v4411_v57 = vld [vmem:[#allocation5 + $0x584] ss:$28 sps:$4 sm:$0xff]  }
  0x93   :  { %2499 = vmatpush1.bf16.msra.mxu1 %v4324_v58  ;;  %2330 = vmatprep.subr.bf16.mxu0 %v4328_v59  ;;  %v4406_v58 = vld [vmem:[#allocation5 + $0x5b0] ss:$28 sps:$4 sm:$0xff]   ;;  %v4409_v59 = vld [vmem:[#allocation5 + $0x580] ss:$28 sps:$4 sm:$0xff]  }
  0x94   :  { %2500 = vmatprep.subr.bf16.mxu1 %v4332_v60  ;;  %v4414_v60 = vld [vmem:[#allocation5 + $0x5ec] ss:$28 sps:$4 sm:$0xff]  }
  0x96   :  { %2331 = vmatpush1.bf16.msra.mxu0 %v4333_v61  ;;  %v4417_v61 = vld [vmem:[#allocation5 + $0x5bc] ss:$28 sps:$4 sm:$0xff]  }
  0x97   :  { %2501 = vmatpush1.bf16.msra.mxu1 %v4330_v62  ;;  %2332 = vmatprep.subr.bf16.mxu0 %v4334_v63  ;;  %v4412_v62 = vld [vmem:[#allocation5 + $0x5e8] ss:$28 sps:$4 sm:$0xff]   ;;  %v4415_v63 = vld [vmem:[#allocation5 + $0x5b8] ss:$28 sps:$4 sm:$0xff]  }
  0x98   :  { %2502 = vmatprep.subr.bf16.mxu1 %v4338_v1  ;;  %v4420_v1 = vld [vmem:[#allocation5 + $0x624] ss:$28 sps:$4 sm:$0xff]  }
  0x9a   :  { %2333 = vmatpush1.bf16.msra.mxu0 %v4339_v2  ;;  %v4423_v2 = vld [vmem:[#allocation5 + $0x5f4] ss:$28 sps:$4 sm:$0xff]  }
  0x9b   :  { %2503 = vmatpush1.bf16.msra.mxu1 %v4336_v3  ;;  %2334 = vmatprep.subr.bf16.mxu0 %v4340_v4  ;;  %v4418_v3 = vld [vmem:[#allocation5 + $0x620] ss:$28 sps:$4 sm:$0xff]   ;;  %v4421_v4 = vld [vmem:[#allocation5 + $0x5f0] ss:$28 sps:$4 sm:$0xff]  }
  0x9c   :  { %2504 = vmatprep.subr.bf16.mxu1 %v4344_v5  ;;  %v4426_v5 = vld [vmem:[#allocation5 + $0x65c] ss:$28 sps:$4 sm:$0xff]  }
  0x9e   :  { %2335 = vmatpush1.bf16.msra.mxu0 %v4345_v6  ;;  %v4429_v6 = vld [vmem:[#allocation5 + $0x62c] ss:$28 sps:$4 sm:$0xff]  }
  0x9f   :  { %2505 = vmatpush1.bf16.msra.mxu1 %v4342_v9  ;;  %2347 = vmatprep.subr.bf16.mxu0 %v4348_v10  ;;  %v4432_v9 = vld [vmem:[#allocation5 + $0x694] ss:$28 sps:$4 sm:$0xff]   ;;  %v4435_v10 = vld [vmem:[#allocation5 + $0x664] ss:$28 sps:$4 sm:$0xff]  }
  0xa0   :  { %2506 = vmatprep.subr.bf16.mxu1 %v4351_v12  ;;  %v4430_v12 = vld [vmem:[#allocation5 + $0x690] ss:$28 sps:$4 sm:$0xff]  }
  0xa1   :  { %2337 = vmatmul.mubr.bf16.vlgmr.msra.gmra.mrb[0].mxu0 %v5005_v13 }
  0xa2   :  { %2348 = vmatpush1.bf16.msra.mxu0 %v4346_v14  ;;  %2379 = vmatprep.mubr.bf16.mxu0 %v5009_v42  ;;  %v4433_v14 = vld [vmem:[#allocation5 + $0x660] ss:$28 sps:$4 sm:$0xff]  }
  0xa3   :  { %2507 = vmatpush1.bf16.msra.mxu1 %v4349_v15  ;;  %2349 = vmatprep.subr.bf16.mxu0 %v4354_v16  ;;  %v4438_v15 = vld [vmem:[#allocation5 + $0x6cc] ss:$28 sps:$4 sm:$0xff]   ;;  %v4441_v16 = vld [vmem:[#allocation5 + $0x69c] ss:$28 sps:$4 sm:$0xff]  }
  0xa4   :  { %2519 = vmatprep.subr.bf16.mxu1 %v4357_v17  ;;  %v4436_v17 = vld [vmem:[#allocation5 + $0x6c8] ss:$28 sps:$4 sm:$0xff]  }
  0xa6   :  { %2350 = vmatpush1.bf16.msra.mxu0 %v4352_v18  ;;  %2509 = vmatmul.mubr.bf16.vlgmr.msra.gmra.mrb[4].mxu1 %v5005_v13  ;;  %v88_v18 = vld [vmem:[#allocation2 + $0x10] sm:$0xff] }
  0xa7   :  { %2520 = vmatpush1.bf16.msra.mxu1 %v4355_v19  ;;  %2351 = vmatprep.subr.bf16.mxu0 %v4360_v20  ;;  %v95_v19 = vld [vmem:[#allocation2 + $0x48] sm:$0xff] }
  0xa8   :  { %2521 = vmatprep.subr.bf16.mxu1 %v4363_v21  ;;  %2551 = vmatprep.mubr.bf16.mxu1 %v5009_v42  ;;  %v4439_v20 = vld [vmem:[#allocation5 + $0x698] ss:$28 sps:$4 sm:$0xff]   ;;  %v4444_v21 = vld [vmem:[#allocation5 + $0x704] ss:$28 sps:$4 sm:$0xff]  }
  0xaa   :  { %2352 = vmatpush1.bf16.msra.mxu0 %v4358_v22  ;;  %v4447_v22 = vld [vmem:[#allocation5 + $0x6d4] ss:$28 sps:$4 sm:$0xff]  }
  0xab   :  { %2522 = vmatpush1.bf16.msra.mxu1 %v4361_v23  ;;  %2353 = vmatprep.subr.bf16.mxu0 %v4366_v24  ;;  %v5013_v23 = vpack.c.bf16 %v95_v19, %v88_v18  ;;  %v4442_v24 = vld [vmem:[#allocation5 + $0x700] ss:$28 sps:$4 sm:$0xff]   ;;  %v4525_v19 = vld [vmem:[#allocation5 + $0x9ac] ss:$28 sps:$4 sm:$0xff]  }
  0xac   :  { %2523 = vmatprep.subr.bf16.mxu1 %v4369_v25  ;;  %v4445_v25 = vld [vmem:[#allocation5 + $0x6d0] ss:$28 sps:$4 sm:$0xff]   ;;  %v4522_v18 = vld [vmem:[#allocation5 + $0x9dc] ss:$28 sps:$4 sm:$0xff]  }
  0xae   :  { %2354 = vmatpush1.bf16.msra.mxu0 %v4364_v26  ;;  %v4450_v26 = vld [vmem:[#allocation5 + $0x73c] ss:$28 sps:$4 sm:$0xff]  }
  0xaf   :  { %2524 = vmatpush1.bf16.msra.mxu1 %v4367_v27  ;;  %2355 = vmatprep.subr.bf16.mxu0 %v4372_v28  ;;  %v4453_v27 = vld [vmem:[#allocation5 + $0x70c] ss:$28 sps:$4 sm:$0xff]   ;;  %v91_v28 = vld [vmem:[#allocation2 + $0x28] sm:$0xff] }
  0xb0   :  { %2525 = vmatprep.subr.bf16.mxu1 %v4375_v29  ;;  %v98_v29 = vld [vmem:[#allocation2 + $0x60] sm:$0xff] }
  0xb2   :  { %2356 = vmatpush1.bf16.msra.mxu0 %v4370_v30  ;;  %v4448_v30 = vld [vmem:[#allocation5 + $0x738] ss:$28 sps:$4 sm:$0xff]  }
  0xb3   :  { %2526 = vmatpush1.bf16.msra.mxu1 %v4373_v31  ;;  %2357 = vmatprep.subr.bf16.mxu0 %v4378_v32  ;;  %v5016_v31 = vpack.c.bf16 %v98_v29, %v91_v28  ;;  %v4451_v32 = vld [vmem:[#allocation5 + $0x708] ss:$28 sps:$4 sm:$0xff]   ;;  %v4537_v29 = vld [vmem:[#allocation5 + $0xa1c] ss:$28 sps:$4 sm:$0xff]  }
  0xb4   :  { %2527 = vmatprep.subr.bf16.mxu1 %v4381_v33  ;;  %v4456_v33 = vld [vmem:[#allocation5 + $0x774] ss:$28 sps:$4 sm:$0xff]   ;;  %v4532_v28 = vld [vmem:[#allocation5 + $0xa48] ss:$28 sps:$4 sm:$0xff]  }
  0xb6   :  { %2358 = vmatpush1.bf16.msra.mxu0 %v4376_v34  ;;  %v4459_v34 = vld [vmem:[#allocation5 + $0x744] ss:$28 sps:$4 sm:$0xff]  }
  0xb7   :  { %2528 = vmatpush1.bf16.msra.mxu1 %v4379_v35  ;;  %2359 = vmatprep.subr.bf16.mxu0 %v4384_v36  ;;  %v4454_v35 = vld [vmem:[#allocation5 + $0x770] ss:$28 sps:$4 sm:$0xff]   ;;  %v4457_v36 = vld [vmem:[#allocation5 + $0x740] ss:$28 sps:$4 sm:$0xff]  }
  0xb8   :  { %2529 = vmatprep.subr.bf16.mxu1 %v4387_v37  ;;  %v4462_v37 = vld [vmem:[#allocation5 + $0x7ac] ss:$28 sps:$4 sm:$0xff]  }
  0xba   :  { %2360 = vmatpush1.bf16.msra.mxu0 %v4382_v38  ;;  %v4465_v38 = vld [vmem:[#allocation5 + $0x77c] ss:$28 sps:$4 sm:$0xff]  }
  0xbb   :  { %2530 = vmatpush1.bf16.msra.mxu1 %v4385_v41  ;;  %2361 = vmatprep.subr.bf16.mxu0 %v4390_v43  ;;  %v4468_v41 = vld [vmem:[#allocation5 + $0x7e4] ss:$28 sps:$4 sm:$0xff]   ;;  %v4471_v43 = vld [vmem:[#allocation5 + $0x7b4] ss:$28 sps:$4 sm:$0xff]  }
  0xbc   :  { %2531 = vmatprep.subr.bf16.mxu1 %v4393_v44  ;;  %v4466_v44 = vld [vmem:[#allocation5 + $0x7e0] ss:$28 sps:$4 sm:$0xff]  }
  0xbe   :  { %2362 = vmatpush1.bf16.msra.mxu0 %v4388_v45  ;;  %v4469_v45 = vld [vmem:[#allocation5 + $0x7b0] ss:$28 sps:$4 sm:$0xff]  }
  0xbf   :  { %2532 = vmatpush1.bf16.msra.mxu1 %v4391_v46  ;;  %2363 = vmatprep.subr.bf16.mxu0 %v4396_v47  ;;  %v4474_v46 = vld [vmem:[#allocation5 + $0x81c] ss:$28 sps:$4 sm:$0xff]   ;;  %v4477_v47 = vld [vmem:[#allocation5 + $0x7ec] ss:$28 sps:$4 sm:$0xff]  }
  0xc0   :  { %2533 = vmatprep.subr.bf16.mxu1 %v4399_v48  ;;  %v4472_v48 = vld [vmem:[#allocation5 + $0x818] ss:$28 sps:$4 sm:$0xff]  }
  0xc2   :  { %2364 = vmatpush1.bf16.msra.mxu0 %v4394_v49  ;;  %v4475_v49 = vld [vmem:[#allocation5 + $0x7e8] ss:$28 sps:$4 sm:$0xff]  }
  0xc3   :  { %2534 = vmatpush1.bf16.msra.mxu1 %v4397_v50  ;;  %2365 = vmatprep.subr.bf16.mxu0 %v4402_v51  ;;  %v4480_v50 = vld [vmem:[#allocation5 + $0x854] ss:$28 sps:$4 sm:$0xff]   ;;  %v4483_v51 = vld [vmem:[#allocation5 + $0x824] ss:$28 sps:$4 sm:$0xff]  }
  0xc4   :  { %2535 = vmatprep.subr.bf16.mxu1 %v4405_v52  ;;  %v4478_v52 = vld [vmem:[#allocation5 + $0x850] ss:$28 sps:$4 sm:$0xff]  }
  0xc6   :  { %2366 = vmatpush1.bf16.msra.mxu0 %v4400_v53  ;;  %v4481_v53 = vld [vmem:[#allocation5 + $0x820] ss:$28 sps:$4 sm:$0xff]  }
  0xc7   :  { %2536 = vmatpush1.bf16.msra.mxu1 %v4403_v55  ;;  %2367 = vmatprep.subr.bf16.mxu0 %v4408_v56  ;;  %v4486_v55 = vld [vmem:[#allocation5 + $0x88c] ss:$28 sps:$4 sm:$0xff]   ;;  %v4489_v56 = vld [vmem:[#allocation5 + $0x85c] ss:$28 sps:$4 sm:$0xff]  }
  0xc8   :  { %2537 = vmatprep.subr.bf16.mxu1 %v4411_v57  ;;  %v4484_v57 = vld [vmem:[#allocation5 + $0x888] ss:$28 sps:$4 sm:$0xff]  }
  0xca   :  { %2368 = vmatpush1.bf16.msra.mxu0 %v4406_v58  ;;  %v4487_v58 = vld [vmem:[#allocation5 + $0x858] ss:$28 sps:$4 sm:$0xff]  }
  0xcb   :  { %2538 = vmatpush1.bf16.msra.mxu1 %v4409_v59  ;;  %2369 = vmatprep.subr.bf16.mxu0 %v4414_v60  ;;  %v4492_v59 = vld [vmem:[#allocation5 + $0x8c4] ss:$28 sps:$4 sm:$0xff]   ;;  %v4495_v60 = vld [vmem:[#allocation5 + $0x894] ss:$28 sps:$4 sm:$0xff]  }
  0xcc   :  { %2539 = vmatprep.subr.bf16.mxu1 %v4417_v61  ;;  %v4490_v61 = vld [vmem:[#allocation5 + $0x8c0] ss:$28 sps:$4 sm:$0xff]  }
  0xce   :  { %2370 = vmatpush1.bf16.msra.mxu0 %v4412_v62  ;;  %v4493_v62 = vld [vmem:[#allocation5 + $0x890] ss:$28 sps:$4 sm:$0xff]  }
  0xcf   :  { %2540 = vmatpush1.bf16.msra.mxu1 %v4415_v63  ;;  %2371 = vmatprep.subr.bf16.mxu0 %v4420_v1  ;;  %v4498_v63 = vld [vmem:[#allocation5 + $0x8fc] ss:$28 sps:$4 sm:$0xff]   ;;  %v4501_v1 = vld [vmem:[#allocation5 + $0x8cc] ss:$28 sps:$4 sm:$0xff]  }
  0xd0   :  { %2541 = vmatprep.subr.bf16.mxu1 %v4423_v2  ;;  %v4496_v2 = vld [vmem:[#allocation5 + $0x8f8] ss:$28 sps:$4 sm:$0xff]  }
  0xd2   :  { %2372 = vmatpush1.bf16.msra.mxu0 %v4418_v3  ;;  %v4499_v3 = vld [vmem:[#allocation5 + $0x8c8] ss:$28 sps:$4 sm:$0xff]  }
  0xd3   :  { %2542 = vmatpush1.bf16.msra.mxu1 %v4421_v4  ;;  %2373 = vmatprep.subr.bf16.mxu0 %v4426_v5  ;;  %v4504_v4 = vld [vmem:[#allocation5 + $0x934] ss:$28 sps:$4 sm:$0xff]   ;;  %v4507_v5 = vld [vmem:[#allocation5 + $0x904] ss:$28 sps:$4 sm:$0xff]  }
  0xd4   :  { %2543 = vmatprep.subr.bf16.mxu1 %v4429_v6  ;;  %v4502_v6 = vld [vmem:[#allocation5 + $0x930] ss:$28 sps:$4 sm:$0xff]  }
  0xd6   :  { %2374 = vmatpush1.bf16.msra.mxu0 %v4424_v7  ;;  %v4505_v7 = vld [vmem:[#allocation5 + $0x900] ss:$28 sps:$4 sm:$0xff]  }
  0xd7   :  { %2544 = vmatpush1.bf16.msra.mxu1 %v4427_v8  ;;  %2375 = vmatprep.subr.bf16.mxu0 %v4432_v9  ;;  %v4510_v8 = vld [vmem:[#allocation5 + $0x96c] ss:$28 sps:$4 sm:$0xff]   ;;  %v4513_v9 = vld [vmem:[#allocation5 + $0x93c] ss:$28 sps:$4 sm:$0xff]  }
  0xd8   :  { %2545 = vmatprep.subr.bf16.mxu1 %v4435_v10  ;;  %v4508_v10 = vld [vmem:[#allocation5 + $0x968] ss:$28 sps:$4 sm:$0xff]  }
  0xda   :  { %2376 = vmatpush1.bf16.msra.mxu0 %v4430_v12  ;;  %v4511_v12 = vld [vmem:[#allocation5 + $0x938] ss:$28 sps:$4 sm:$0xff]  }
  0xdb   :  { %2546 = vmatpush1.bf16.msra.mxu1 %v4433_v14  ;;  %2377 = vmatprep.subr.bf16.mxu0 %v4438_v15  ;;  %v4516_v14 = vld [vmem:[#allocation5 + $0x9a4] ss:$28 sps:$4 sm:$0xff]   ;;  %v4519_v15 = vld [vmem:[#allocation5 + $0x974] ss:$28 sps:$4 sm:$0xff]  }
  0xdc   :  { %2547 = vmatprep.subr.bf16.mxu1 %v4441_v16  ;;  %v4514_v16 = vld [vmem:[#allocation5 + $0x9a0] ss:$28 sps:$4 sm:$0xff]  }
  0xde   :  { %2378 = vmatpush1.bf16.msra.mxu0 %v4436_v17  ;;  %v4517_v17 = vld [vmem:[#allocation5 + $0x970] ss:$28 sps:$4 sm:$0xff]  }
  0xdf   :  { %2548 = vmatpush1.bf16.msra.mxu1 %v4439_v20  ;;  %2390 = vmatprep.subr.bf16.mxu0 %v4444_v21  ;;  %v4520_v20 = vld [vmem:[#allocation5 + $0x9d8] ss:$28 sps:$4 sm:$0xff]   ;;  %v4523_v21 = vld [vmem:[#allocation5 + $0x9a8] ss:$28 sps:$4 sm:$0xff]  }
  0xe0   :  { %2549 = vmatprep.subr.bf16.mxu1 %v4447_v22  ;;  %v4528_v22 = vld [vmem:[#allocation5 + $0xa14] ss:$28 sps:$4 sm:$0xff]  }
  0xe1   :  { %2380 = vmatmul.mubr.bf16.vlgmr.msra.gmra.mrb[0].mxu0 %v5013_v23 }
  0xe2   :  { %2391 = vmatpush1.bf16.msra.mxu0 %v4442_v24  ;;  %2422 = vmatprep.mubr.bf16.mxu0 %v5016_v31  ;;  %v4531_v24 = vld [vmem:[#allocation5 + $0x9e4] ss:$28 sps:$4 sm:$0xff]  }
  0xe3   :  { %2550 = vmatpush1.bf16.msra.mxu1 %v4445_v25  ;;  %2392 = vmatprep.subr.bf16.mxu0 %v4450_v26  ;;  %v4526_v25 = vld [vmem:[#allocation5 + $0xa10] ss:$28 sps:$4 sm:$0xff]   ;;  %v4529_v26 = vld [vmem:[#allocation5 + $0x9e0] ss:$28 sps:$4 sm:$0xff]  }
  0xe4   :  { %2562 = vmatprep.subr.bf16.mxu1 %v4453_v27  ;;  %v4534_v27 = vld [vmem:[#allocation5 + $0xa4c] ss:$28 sps:$4 sm:$0xff]  }
  0xe6   :  { %2393 = vmatpush1.bf16.msra.mxu0 %v4448_v30  ;;  %2552 = vmatmul.mubr.bf16.vlgmr.msra.gmra.mrb[4].mxu1 %v5013_v23  ;;  %v4535_v30 = vld [vmem:[#allocation5 + $0xa18] ss:$28 sps:$4 sm:$0xff]  }
  0xe7   :  { %2563 = vmatpush1.bf16.msra.mxu1 %v4451_v32  ;;  %2394 = vmatprep.subr.bf16.mxu0 %v4456_v33  ;;  %v90_v32 = vld [vmem:[#allocation2 + $0x20] sm:$0xff]  ;;  %v97_v33 = vld [vmem:[#allocation2 + $0x58] sm:$0xff] }
  0xe8   :  { %2564 = vmatprep.subr.bf16.mxu1 %v4459_v34  ;;  %2594 = vmatprep.mubr.bf16.mxu1 %v5016_v31  ;;  %v4543_v34 = vld [vmem:[#allocation5 + $0x14] ss:$28 sps:$4 sm:$0xff]  }
  0xea   :  { %2395 = vmatpush1.bf16.msra.mxu0 %v4454_v35  ;;  %v4540_v35 = vld [vmem:[#allocation5 + $0xa54] ss:$28 sps:$4 sm:$0xff]  }
  0xeb   :  { %2565 = vmatpush1.bf16.msra.mxu1 %v4457_v36  ;;  %2396 = vmatprep.subr.bf16.mxu0 %v4462_v37  ;;  %v5021_v36 = vpack.c.bf16 %v97_v33, %v90_v32  ;;  %v4538_v37 = vld [vmem:[#allocation5 + $0xa50] ss:$28 sps:$4 sm:$0xff]   ;;  %v4605_v32 = vld [vmem:[#allocation5 + $0x320] ss:$28 sps:$4 sm:$0xff]   ;;  %v4609_v33 = vld [vmem:[#allocation5 + $0x398] ss:$28 sps:$4 sm:$0xff]  }
  0xec   :  { %2566 = vmatprep.subr.bf16.mxu1 %v4465_v38  ;;  %v4541_v38 = vld [vmem:[#allocation5 + $0x10] ss:$28 sps:$4 sm:$0xff]  }
  0xee   :  { %2397 = vmatpush1.bf16.msra.mxu0 %v4460_v39  ;;  %v4546_v39 = vld [vmem:[#allocation5 + $0x4c] ss:$28 sps:$4 sm:$0xff]  }
  0xef   :  { %2567 = vmatpush1.bf16.msra.mxu1 %v4463_v40  ;;  %2398 = vmatprep.subr.bf16.mxu0 %v4468_v41  ;;  %v4552_v40 = vld [vmem:[#allocation5 + $0xa8c] ss:$28 sps:$4 sm:$0xff]  }
  0xf0   :  { %2568 = vmatprep.subr.bf16.mxu1 %v4471_v43  ;;  %v4544_v41 = vld [vmem:[#allocation5 + $0x48] ss:$28 sps:$4 sm:$0xff]  }
  0xf1   :  { %v4549_v43 = vld [vmem:[#allocation5 + $0x84] ss:$28 sps:$4 sm:$0xff]  }
  0xf2   :  { %2399 = vmatpush1.bf16.msra.mxu0 %v4466_v44  ;;  %v4550_v44 = vld [vmem:[#allocation5 + $0xa88] ss:$28 sps:$4 sm:$0xff]  }
  0xf3   :  { %2569 = vmatpush1.bf16.msra.mxu1 %v4469_v45  ;;  %2400 = vmatprep.subr.bf16.mxu0 %v4474_v46  ;;  %v4564_v45 = vld [vmem:[#allocation5 + $0xa94] ss:$28 sps:$4 sm:$0xff]   ;;  %v4547_v46 = vld [vmem:[#allocation5 + $0x80] ss:$28 sps:$4 sm:$0xff]  }
  0xf4   :  { %2570 = vmatprep.subr.bf16.mxu1 %v4477_v47  ;;  %v4555_v47 = vld [vmem:[#allocation5 + $0xbc] ss:$28 sps:$4 sm:$0xff]  }
  0xf6   :  { %2401 = vmatpush1.bf16.msra.mxu0 %v4472_v48  ;;  %v4553_v48 = vld [vmem:[#allocation5 + $0xb8] ss:$28 sps:$4 sm:$0xff]  }
  0xf7   :  { %2571 = vmatpush1.bf16.msra.mxu1 %v4475_v49  ;;  %2402 = vmatprep.subr.bf16.mxu0 %v4480_v50  ;;  %v4558_v49 = vld [vmem:[#allocation5 + $0xf4] ss:$28 sps:$4 sm:$0xff]  }
  0xf8   :  { %2572 = vmatprep.subr.bf16.mxu1 %v4483_v51  ;;  %v4556_v50 = vld [vmem:[#allocation5 + $0xf0] ss:$28 sps:$4 sm:$0xff]  }
  0xf9   :  { %v4561_v51 = vld [vmem:[#allocation5 + $0x12c] ss:$28 sps:$4 sm:$0xff]  }
  0xfa   :  { %2403 = vmatpush1.bf16.msra.mxu0 %v4478_v52  ;;  %v4562_v52 = vld [vmem:[#allocation5 + $0xa90] ss:$28 sps:$4 sm:$0xff]  }
  0xfb   :  { %2573 = vmatpush1.bf16.msra.mxu1 %v4481_v53  ;;  %2404 = vmatprep.subr.bf16.mxu0 %v4486_v55  ;;  %v4568_v53 = vld [vmem:[#allocation5 + $0x1d8] ss:$28 sps:$4 sm:$0xff]   ;;  %v4559_v55 = vld [vmem:[#allocation5 + $0x128] ss:$28 sps:$4 sm:$0xff]  }
  0xfc   :  { %2574 = vmatprep.subr.bf16.mxu1 %v4489_v56  ;;  %v4567_v56 = vld [vmem:[#allocation5 + $0x164] ss:$28 sps:$4 sm:$0xff]  }
  0xfe   :  { %2405 = vmatpush1.bf16.msra.mxu0 %v4484_v57  ;;  %v4565_v57 = vld [vmem:[#allocation5 + $0x160] ss:$28 sps:$4 sm:$0xff]  }
  0xff   :  { %2575 = vmatpush1.bf16.msra.mxu1 %v4487_v58  ;;  %2406 = vmatprep.subr.bf16.mxu0 %v4492_v59  ;;  %v4569_v58 = vld [vmem:[#allocation5 + $0x18] ss:$28 sps:$4 sm:$0xff]  }
 0x100   :  { %2576 = vmatprep.subr.bf16.mxu1 %v4495_v60  ;;  %v4572_v59 = vld [vmem:[#allocation5 + $0x19c] ss:$28 sps:$4 sm:$0xff]  }
 0x101   :  { %v4570_v60 = vld [vmem:[#allocation5 + $0x198] ss:$28 sps:$4 sm:$0xff]  }
 0x102   :  { %2407 = vmatpush1.bf16.msra.mxu0 %v4490_v61  ;;  %v4573_v61 = vld [vmem:[#allocation5 + $0x210] ss:$28 sps:$4 sm:$0xff]  }
 0x103   :  { %2577 = vmatpush1.bf16.msra.mxu1 %v4493_v62  ;;  %2408 = vmatprep.subr.bf16.mxu0 %v4498_v63  ;;  %v4574_v62 = vld [vmem:[#allocation5 + $0x50] ss:$28 sps:$4 sm:$0xff]  }
 0x104   :  { %2578 = vmatprep.subr.bf16.mxu1 %v4501_v1  ;;  %v4577_v1 = vld [vmem:[#allocation5 + $0x1d4] ss:$28 sps:$4 sm:$0xff]  }
 0x106   :  { %2409 = vmatpush1.bf16.msra.mxu0 %v4496_v2 }
 0x107   :  { %2579 = vmatpush1.bf16.msra.mxu1 %v4499_v3  ;;  %2410 = vmatprep.subr.bf16.mxu0 %v4504_v4  ;;  %v4578_v3 = vld [vmem:[#allocation5 + $0x248] ss:$28 sps:$4 sm:$0xff]  }
 0x108   :  { %2580 = vmatprep.subr.bf16.mxu1 %v4507_v5  ;;  %v4575_v5 = vld [vmem:[#allocation5 + $0x1d0] ss:$28 sps:$4 sm:$0xff]  }
 0x10a   :  { %2411 = vmatpush1.bf16.msra.mxu0 %v4502_v6  ;;  %v4579_v6 = vld [vmem:[#allocation5 + $0x88] ss:$28 sps:$4 sm:$0xff]  }
 0x10b   :  { %2581 = vmatpush1.bf16.msra.mxu1 %v4505_v7  ;;  %2412 = vmatprep.subr.bf16.mxu0 %v4510_v8  ;;  %v4582_v7 = vld [vmem:[#allocation5 + $0x20c] ss:$28 sps:$4 sm:$0xff]   ;;  %v4583_v8 = vld [vmem:[#allocation5 + $0x280] ss:$28 sps:$4 sm:$0xff]  }
 0x10c   :  { %2582 = vmatprep.subr.bf16.mxu1 %v4513_v9  ;;  %v4580_v9 = vld [vmem:[#allocation5 + $0x208] ss:$28 sps:$4 sm:$0xff]  }
 0x10e   :  { %2413 = vmatpush1.bf16.msra.mxu0 %v4508_v10  ;;  %v4584_v10 = vld [vmem:[#allocation5 + $0xc0] ss:$28 sps:$4 sm:$0xff]  }
 0x10f   :  { %2583 = vmatpush1.bf16.msra.mxu1 %v4511_v12  ;;  %2414 = vmatprep.subr.bf16.mxu0 %v4516_v14  ;;  %v4587_v12 = vld [vmem:[#allocation5 + $0x244] ss:$28 sps:$4 sm:$0xff]   ;;  %v4588_v14 = vld [vmem:[#allocation5 + $0x2b8] ss:$28 sps:$4 sm:$0xff]  }
 0x110   :  { %2584 = vmatprep.subr.bf16.mxu1 %v4519_v15  ;;  %v4589_v15 = vld [vmem:[#allocation5 + $0xf8] ss:$28 sps:$4 sm:$0xff]  }
 0x112   :  { %2415 = vmatpush1.bf16.msra.mxu0 %v4514_v16  ;;  %v4592_v16 = vld [vmem:[#allocation5 + $0x27c] ss:$28 sps:$4 sm:$0xff]  }
 0x113   :  { %2585 = vmatpush1.bf16.msra.mxu1 %v4517_v17  ;;  %2416 = vmatprep.subr.bf16.mxu0 %v4522_v18  ;;  %v4593_v17 = vld [vmem:[#allocation5 + $0x2f0] ss:$28 sps:$4 sm:$0xff]   ;;  %v4590_v18 = vld [vmem:[#allocation5 + $0x278] ss:$28 sps:$4 sm:$0xff]  }
 0x114   :  { %2586 = vmatprep.subr.bf16.mxu1 %v4525_v19  ;;  %v4594_v19 = vld [vmem:[#allocation5 + $0x130] ss:$28 sps:$4 sm:$0xff]  }
 0x116   :  { %2417 = vmatpush1.bf16.msra.mxu0 %v4520_v20  ;;  %v4597_v20 = vld [vmem:[#allocation5 + $0x2b4] ss:$28 sps:$4 sm:$0xff]  }
 0x117   :  { %2587 = vmatpush1.bf16.msra.mxu1 %v4523_v21  ;;  %2418 = vmatprep.subr.bf16.mxu0 %v4528_v22  ;;  %v4598_v21 = vld [vmem:[#allocation5 + $0x328] ss:$28 sps:$4 sm:$0xff]   ;;  %v4595_v22 = vld [vmem:[#allocation5 + $0x2b0] ss:$28 sps:$4 sm:$0xff]  }
 0x118   :  { %2588 = vmatprep.subr.bf16.mxu1 %v4531_v24  ;;  %v4599_v24 = vld [vmem:[#allocation5 + $0x168] ss:$28 sps:$4 sm:$0xff]  }
 0x11a   :  { %2419 = vmatpush1.bf16.msra.mxu0 %v4526_v25  ;;  %v4602_v25 = vld [vmem:[#allocation5 + $0x2ec] ss:$28 sps:$4 sm:$0xff]  }
 0x11b   :  { %2589 = vmatpush1.bf16.msra.mxu1 %v4529_v26  ;;  %2420 = vmatprep.subr.bf16.mxu0 %v4534_v27  ;;  %v4603_v26 = vld [vmem:[#allocation5 + $0x360] ss:$28 sps:$4 sm:$0xff]   ;;  %v4600_v27 = vld [vmem:[#allocation5 + $0x2e8] ss:$28 sps:$4 sm:$0xff]  }
 0x11c   :  { %2590 = vmatprep.subr.bf16.mxu1 %v4537_v29  ;;  %v4607_v29 = vld [vmem:[#allocation5 + $0x324] ss:$28 sps:$4 sm:$0xff]  }
 0x11e   :  { %2421 = vmatpush1.bf16.msra.mxu0 %v4532_v28  ;;  %v4604_v28 = vld [vmem:[#allocation5 + $0x1a0] ss:$28 sps:$4 sm:$0xff]  }
 0x11f   :  { %2591 = vmatpush1.bf16.msra.mxu1 %v4535_v30  ;;  %2648 = vmatprep.subr.bf16.mxu0 %v4543_v34  ;;  %v4608_v30 = vld [vmem:[#allocation5 + $0x558] ss:$28 sps:$4 sm:$0xff]  }
 0x120   :  { %2592 = vmatprep.subr.bf16.mxu1 %v4540_v35  ;;  %v4612_v34 = vld [vmem:[#allocation5 + $0x35c] ss:$28 sps:$4 sm:$0xff]   ;;  %v4613_v35 = vld [vmem:[#allocation5 + $0x590] ss:$28 sps:$4 sm:$0xff]  }
 0x121   :  { %2423 = vmatmul.mubr.bf16.vlgmr.msra.gmra.mrb[0].mxu0 %v5021_v36 }
 0x122   :  { %2649 = vmatpush1.bf16.msra.mxu0 %v4541_v38  ;;  %2680 = vmatprep.mubr.bf16.mxu0 %v5001_v54  ;;  %v4614_v38 = vld [vmem:[#allocation5 + $0x3d0] ss:$28 sps:$4 sm:$0xff]  }
 0x123   :  { %2593 = vmatpush1.bf16.msra.mxu1 %v4538_v37  ;;  %2650 = vmatprep.subr.bf16.mxu0 %v4546_v39  ;;  %v4610_v37 = vld [vmem:[#allocation5 + $0x358] ss:$28 sps:$4 sm:$0xff]  }
 0x124   :  { %2605 = vmatprep.subr.bf16.mxu1 %v4552_v40  ;;  %v4617_v39 = vld [vmem:[#allocation5 + $0x394] ss:$28 sps:$4 sm:$0xff]   ;;  %v4618_v40 = vld [vmem:[#allocation5 + $0x5c8] ss:$28 sps:$4 sm:$0xff]  }
 0x126   :  { %2595 = vmatmul.mubr.bf16.vlgmr.msra.gmra.mrb[4].mxu1 %v5021_v36  ;;  %2651 = vmatpush1.bf16.msra.mxu0 %v4544_v41  ;;  %v4615_v41 = vld [vmem:[#allocation5 + $0x390] ss:$28 sps:$4 sm:$0xff]  }
 0x127   :  { %2652 = vmatprep.subr.bf16.mxu0 %v4549_v43  ;;  %2606 = vmatpush1.bf16.msra.mxu1 %v4550_v44  ;;  %v4619_v43 = vld [vmem:[#allocation5 + $0x408] ss:$28 sps:$4 sm:$0xff]  }
 0x128   :  { %2637 = vmatprep.mubr.bf16.mxu1 %v4899_v0  ;;  %2777 = vmatprep.subr.bf16.mxu1 %v4564_v45  ;;  %v4622_v44 = vld [vmem:[#allocation5 + $0x3cc] ss:$28 sps:$4 sm:$0xff]   ;;  %v4623_v45 = vld [vmem:[#allocation5 + $0x600] ss:$28 sps:$4 sm:$0xff]  }
 0x12a   :  { %2653 = vmatpush1.bf16.msra.mxu0 %v4547_v46  ;;  %v4620_v46 = vld [vmem:[#allocation5 + $0x3c8] ss:$28 sps:$4 sm:$0xff]  }
 0x12b   :  { %2654 = vmatprep.subr.bf16.mxu0 %v4555_v47  ;;  %v4624_v47 = vld [vmem:[#allocation5 + $0x440] ss:$28 sps:$4 sm:$0xff]  }
 0x12e   :  { %2655 = vmatpush1.bf16.msra.mxu0 %v4553_v48  ;;  %v4627_v48 = vld [vmem:[#allocation5 + $0x404] ss:$28 sps:$4 sm:$0xff]  }
 0x12f   :  { %2656 = vmatprep.subr.bf16.mxu0 %v4558_v49  ;;  %v4628_v49 = vld [vmem:[#allocation5 + $0x638] ss:$28 sps:$4 sm:$0xff]  }
 0x132   :  { %3814 = vmatmul.mubr.msk.bf16.vlgmr.msra.gmra.mrb[4].mxu1 %vm2300_vm0, %v4997_v11  ;;  %2657 = vmatpush1.bf16.msra.mxu0 %v4556_v50  ;;  %v4625_v50 = vld [vmem:[#allocation5 + $0x400] ss:$28 sps:$4 sm:$0xff]  }
 0x133   :  { %2658 = vmatprep.subr.bf16.mxu0 %v4561_v51  ;;  %2778 = vmatpush1.bf16.msra.mxu1 %v4562_v52  ;;  %v4629_v51 = vld [vmem:[#allocation5 + $0x478] ss:$28 sps:$4 sm:$0xff]  }
 0x134   :  { %2809 = vmatprep.mubr.bf16.mxu1 %v4899_v0  ;;  %3818 = vmatprep.subr.bf16.mxu1 %v4568_v53  ;;  %v4632_v52 = vld [vmem:[#allocation5 + $0x43c] ss:$28 sps:$4 sm:$0xff]   ;;  %v4633_v53 = vld [vmem:[#allocation5 + $0x670] ss:$28 sps:$4 sm:$0xff]  }
 0x136   :  { %2659 = vmatpush1.bf16.msra.mxu0 %v4559_v55  ;;  %v4634_v55 = vld [vmem:[#allocation5 + $0x4b0] ss:$28 sps:$4 sm:$0xff]  }
 0x137   :  { %2660 = vmatprep.subr.bf16.mxu0 %v4567_v56  ;;  %v4638_v56 = vld [vmem:[#allocation5 + $0x6a8] ss:$28 sps:$4 sm:$0xff]  }
 0x139   :  { %v5030_v63 = vpop.f32.mrb[0].mxu1 }
 0x13a   :  { %2661 = vmatpush1.bf16.msra.mxu0 %v4565_v57  ;;  %3815 = vmatmul.mubr.msk.bf16.vlgmr.msra.gmra.mrb[8].mxu1 %vm2300_vm0, %v4997_v11  ;;  %v5034_v2 = vpop.f32.mrb[1].mxu1  ;;  %v4635_v57 = vld [vmem:[#allocation5 + $0x470] ss:$28 sps:$4 sm:$0xff]  }
 0x13b   :  { %3819 = vmatpush3.bf16.msra.mxu1 %v4569_v58  ;;  %2662 = vmatprep.subr.bf16.mxu0 %v4572_v59  ;;  %v5036_v0 = vpop.f32.mrb[2].mxu1  ;;  %v4639_v58 = vld [vmem:[#allocation5 + $0x4e8] ss:$28 sps:$4 sm:$0xff]  }
 0x13c   :  { %3820 = vmatprep.subr.bf16.mxu1 %v4573_v61  ;;  %2852 = vmatprep.mubr.bf16.mxu1 %v5001_v54  ;;  %v5039_v4 = vpop.f32.mrb[3].mxu1  ;;  %v4585_v54 = vld [vmem:[#allocation5 + $0x240] ss:$28 sps:$4 sm:$0xff]   ;;  %v4642_v59 = vld [vmem:[#allocation5 + $0x4ac] ss:$28 sps:$4 sm:$0xff]  }
 0x13d   :  { %v4640_v61 = vld [vmem:[#allocation5 + $0x4a8] ss:$28 sps:$4 sm:$0xff]  }
 0x13e   :  { %2663 = vmatpush1.bf16.msra.mxu0 %v4570_v60  ;;  %v4643_v60 = vld [vmem:[#allocation5 + $0x6e0] ss:$28 sps:$4 sm:$0xff]  }
 0x13f   :  { %3821 = vmatpush3.bf16.msra.mxu1 %v4574_v62  ;;  %2664 = vmatprep.subr.bf16.mxu0 %v4577_v1  ;;  %v4644_v62 = vld [vmem:[#allocation5 + $0x520] ss:$28 sps:$4 sm:$0xff]  }
 0x140   :  { %3822 = vmatprep.subr.bf16.mxu1 %v4578_v3  ;;  %v4647_v1 = vld [vmem:[#allocation5 + $0x4e4] ss:$28 sps:$4 sm:$0xff]   ;;  %v4648_v3 = vld [vmem:[#allocation5 + $0x8d8] ss:$28 sps:$4 sm:$0xff]  }
 0x142   :  { %2665 = vmatpush1.bf16.msra.mxu0 %v4575_v5  ;;  %v4645_v5 = vld [vmem:[#allocation5 + $0x4e0] ss:$28 sps:$4 sm:$0xff]  }
 0x143   :  { %3823 = vmatpush3.bf16.msra.mxu1 %v4579_v6  ;;  %2666 = vmatprep.subr.bf16.mxu0 %v4582_v7  ;;  %v4649_v6 = vld [vmem:[#allocation5 + $0x718] ss:$28 sps:$4 sm:$0xff]  }
 0x144   :  { %3824 = vmatprep.subr.bf16.mxu1 %v4583_v8  ;;  %v4652_v7 = vld [vmem:[#allocation5 + $0x51c] ss:$28 sps:$4 sm:$0xff]   ;;  %v4653_v8 = vld [vmem:[#allocation5 + $0x910] ss:$28 sps:$4 sm:$0xff]  }
 0x146   :  { %2667 = vmatpush1.bf16.msra.mxu0 %v4580_v9  ;;  %v4650_v9 = vld [vmem:[#allocation5 + $0x518] ss:$28 sps:$4 sm:$0xff]  }
 0x147   :  { %3825 = vmatpush3.bf16.msra.mxu1 %v4584_v10  ;;  %2668 = vmatprep.subr.bf16.mxu0 %v4587_v12  ;;  %v4654_v10 = vld [vmem:[#allocation5 + $0x750] ss:$28 sps:$4 sm:$0xff]  }
 0x148   :  { %3826 = vmatprep.subr.bf16.mxu1 %v4588_v14  ;;  %v4657_v12 = vld [vmem:[#allocation5 + $0x554] ss:$28 sps:$4 sm:$0xff]   ;;  %v4658_v14 = vld [vmem:[#allocation5 + $0x948] ss:$28 sps:$4 sm:$0xff]  }
 0x14a   :  { %2669 = vmatpush1.bf16.msra.mxu0 %v4585_v54  ;;  %v4655_v54 = vld [vmem:[#allocation5 + $0x550] ss:$28 sps:$4 sm:$0xff]  }
 0x14b   :  { %3827 = vmatpush3.bf16.msra.mxu1 %v4589_v15  ;;  %2670 = vmatprep.subr.bf16.mxu0 %v4592_v16  ;;  %v4659_v15 = vld [vmem:[#allocation5 + $0x788] ss:$28 sps:$4 sm:$0xff]  }
 0x14c   :  { %3828 = vmatprep.subr.bf16.mxu1 %v4593_v17  ;;  %v4662_v16 = vld [vmem:[#allocation5 + $0x58c] ss:$28 sps:$4 sm:$0xff]   ;;  %v4663_v17 = vld [vmem:[#allocation5 + $0x980] ss:$28 sps:$4 sm:$0xff]  }
 0x14e   :  { %2671 = vmatpush1.bf16.msra.mxu0 %v4590_v18  ;;  %v4660_v18 = vld [vmem:[#allocation5 + $0x588] ss:$28 sps:$4 sm:$0xff]  }
 0x14f   :  { %3829 = vmatpush3.bf16.msra.mxu1 %v4594_v19  ;;  %2672 = vmatprep.subr.bf16.mxu0 %v4597_v20  ;;  %v4664_v19 = vld [vmem:[#allocation5 + $0x7c0] ss:$28 sps:$4 sm:$0xff]  }
 0x150   :  { %3830 = vmatprep.subr.bf16.mxu1 %v4598_v21  ;;  %v4667_v20 = vld [vmem:[#allocation5 + $0x5c4] ss:$28 sps:$4 sm:$0xff]   ;;  %v4668_v21 = vld [vmem:[#allocation5 + $0x9b8] ss:$28 sps:$4 sm:$0xff]  }
 0x152   :  { %2673 = vmatpush1.bf16.msra.mxu0 %v4595_v22  ;;  %v4665_v22 = vld [vmem:[#allocation5 + $0x5c0] ss:$28 sps:$4 sm:$0xff]  }
 0x153   :  { %3831 = vmatpush3.bf16.msra.mxu1 %v4599_v24  ;;  %2674 = vmatprep.subr.bf16.mxu0 %v4602_v25  ;;  %v4669_v24 = vld [vmem:[#allocation5 + $0x7f8] ss:$28 sps:$4 sm:$0xff]  }
 0x154   :  { %3832 = vmatprep.subr.bf16.mxu1 %v4603_v26  ;;  %v4672_v25 = vld [vmem:[#allocation5 + $0x5fc] ss:$28 sps:$4 sm:$0xff]   ;;  %v4673_v26 = vld [vmem:[#allocation5 + $0x9f0] ss:$28 sps:$4 sm:$0xff]  }
 0x156   :  { %2675 = vmatpush1.bf16.msra.mxu0 %v4600_v27  ;;  %v4670_v27 = vld [vmem:[#allocation5 + $0x5f8] ss:$28 sps:$4 sm:$0xff]  }
 0x157   :  { %3833 = vmatpush3.bf16.msra.mxu1 %v4604_v28  ;;  %2676 = vmatprep.subr.bf16.mxu0 %v4607_v29  ;;  %v4674_v28 = vld [vmem:[#allocation5 + $0x830] ss:$28 sps:$4 sm:$0xff]  }
 0x158   :  { %3840 = vmatprep.subr.bf16.mxu1 %v4608_v30  ;;  %v4677_v29 = vld [vmem:[#allocation5 + $0x634] ss:$28 sps:$4 sm:$0xff]   ;;  %v4678_v30 = vld [vmem:[#allocation5 + $0xa28] ss:$28 sps:$4 sm:$0xff]  }
 0x15a   :  { %2677 = vmatpush1.bf16.msra.mxu0 %v4605_v32  ;;  %2853 = vmatmul.mubr.bf16.vlgmr.msra.gmra.mrb[12].mxu1 %v5005_v13  ;;  %v4675_v32 = vld [vmem:[#allocation5 + $0x630] ss:$28 sps:$4 sm:$0xff]  }
 0x15b   :  { %3841 = vmatpush3.bf16.msra.mxu1 %v4609_v33  ;;  %2678 = vmatprep.subr.bf16.mxu0 %v4612_v34  ;;  %v4679_v33 = vld [vmem:[#allocation5 + $0x868] ss:$28 sps:$4 sm:$0xff]  }
 0x15c   :  { %3842 = vmatprep.subr.bf16.mxu1 %v4613_v35  ;;  %2893 = vmatprep.mubr.bf16.mxu1 %v5009_v42  ;;  %v4682_v34 = vld [vmem:[#allocation5 + $0x66c] ss:$28 sps:$4 sm:$0xff]   ;;  %v4683_v35 = vld [vmem:[#allocation5 + $0xa60] ss:$28 sps:$4 sm:$0xff]  }
 0x15e   :  { %2679 = vmatpush1.bf16.msra.mxu0 %v4610_v37  ;;  %v4680_v37 = vld [vmem:[#allocation5 + $0x668] ss:$28 sps:$4 sm:$0xff]  }
 0x15f   :  { %3843 = vmatpush3.bf16.msra.mxu1 %v4614_v38  ;;  %2691 = vmatprep.subr.bf16.mxu0 %v4617_v39  ;;  %v4684_v38 = vld [vmem:[#allocation5 + $0x8a0] ss:$28 sps:$4 sm:$0xff]  }
 0x160   :  { %3844 = vmatprep.subr.bf16.mxu1 %v4618_v40  ;;  %v4687_v39 = vld [vmem:[#allocation5 + $0x6a4] ss:$28 sps:$4 sm:$0xff]  }
 0x161   :  { %2681 = vmatmul.mubr.bf16.vlgmr.msra.gmra.mrb[4].mxu0 %v5005_v13  ;;  %v4630_v13 = vld [vmem:[#allocation5 + $0x438] ss:$28 sps:$4 sm:$0xff]   ;;  %v3028_v40 = vld [vmem:[#allocation8 + $0x80] sm:$0xff] }
 0x162   :  { %2692 = vmatpush1.bf16.msra.mxu0 %v4615_v41  ;;  %2723 = vmatprep.mubr.bf16.mxu0 %v5009_v42  ;;  %v4637_v42 = vld [vmem:[#allocation5 + $0x474] ss:$28 sps:$4 sm:$0xff]   ;;  %v3029_v41 = vld [vmem:[#allocation8 + $0x88] sm:$0xff] }
 0x163   :  { %3845 = vmatpush3.bf16.msra.mxu1 %v4619_v43  ;;  %2693 = vmatprep.subr.bf16.mxu0 %v4622_v44  ;;  %v4685_v43 = vld [vmem:[#allocation5 + $0x6a0] ss:$28 sps:$4 sm:$0xff]  }
 0x164   :  { %3846 = vmatprep.subr.bf16.mxu1 %v4623_v45  ;;  %v4690_v44 = vld [vmem:[#allocation5 + $0x6dc] ss:$28 sps:$4 sm:$0xff]  }
 0x165   :  { %v4691_v45 = vld [vmem:[#allocation5 + $0xa98] ss:$28 sps:$4 sm:$0xff]  }
 0x166   :  { %2694 = vmatpush1.bf16.msra.mxu0 %v4620_v46  ;;  %v4900_v46 = vmov 0.0  }
 0x167   :  { %3847 = vmatpush3.bf16.msra.mxu1 %v4624_v47  ;;  %2695 = vmatprep.subr.bf16.mxu0 %v4627_v48  ;;  %v4059_v47 = vpack.c.bf16 %v3029_v41, %v3028_v40  ;;  %v4688_v48 = vld [vmem:[#allocation5 + $0x6d8] ss:$28 sps:$4 sm:$0xff]  }
 0x168   :  { %3848 = vmatprep.subr.bf16.mxu1 %v4628_v49  ;;  %v4694_v49 = vld [vmem:[#allocation5 + $0x714] ss:$28 sps:$4 sm:$0xff]   ;;  %v3043_v41 = vld [vmem:[#allocation8 + $0xf8] sm:$0xff] }
 0x169   :  { %v3042_v40 = vld [vmem:[#allocation8 + $0xf0] sm:$0xff] }
 0x16a   :  { %2696 = vmatpush1.bf16.msra.mxu0 %v4625_v50  ;;  %v3012_v50 = vld [vmem:[#allocation8] sm:$0xff] }
 0x16b   :  { %3849 = vmatpush3.bf16.msra.mxu1 %v4629_v51  ;;  %2697 = vmatprep.subr.bf16.mxu0 %v4632_v52  ;;  %v3013_v51 = vld [vmem:[#allocation8 + $0x8] sm:$0xff]  ;;  %v3030_v52 = vld [vmem:[#allocation8 + $0x90] sm:$0xff] }
 0x16c   :  { %3850 = vmatprep.subr.bf16.mxu1 %v4633_v53  ;;  %v3031_v53 = vld [vmem:[#allocation8 + $0x98] sm:$0xff] }
 0x16e   :  { %2698 = vmatpush1.bf16.msra.mxu0 %v4630_v13  ;;  %v4692_v13 = vld [vmem:[#allocation5 + $0x710] ss:$28 sps:$4 sm:$0xff]  }
 0x16f   :  { %3851 = vmatpush3.bf16.msra.mxu1 %v4634_v55  ;;  %2699 = vmatprep.subr.bf16.mxu0 %v4637_v42  ;;  %v4697_v55 = vld [vmem:[#allocation5 + $0x74c] ss:$28 sps:$4 sm:$0xff]   ;;  %v4061_v42 = vpack.c.bf16 %v3013_v51, %v3012_v50  ;;  %v4713_v51 = vld [vmem:[#allocation5 + $0x898] ss:$28 sps:$4 sm:$0xff]  }
 0x170   :  { %3852 = vmatprep.subr.bf16.mxu1 %v4638_v56  ;;  %v4063_v56 = vpack.c.bf16 %v3031_v53, %v3030_v52  ;;  %v3061_v50 = vld [vmem:[#allocation8 + $0x188] sm:$0xff]  ;;  %v4718_v52 = vld [vmem:[#allocation5 + $0x8d4] ss:$28 sps:$4 sm:$0xff]  }
 0x172   :  { %2700 = vmatpush1.bf16.msra.mxu0 %v4635_v57  ;;  %v3014_v57 = vld [vmem:[#allocation8 + $0x10] sm:$0xff] }
 0x173   :  { %3853 = vmatpush3.bf16.msra.mxu1 %v4639_v58  ;;  %2701 = vmatprep.subr.bf16.mxu0 %v4642_v59  ;;  %v3015_v58 = vld [vmem:[#allocation8 + $0x18] sm:$0xff]  ;;  %v3032_v59 = vld [vmem:[#allocation8 + $0xa0] sm:$0xff] }
 0x174   :  { %3854 = vmatprep.subr.bf16.mxu1 %v4643_v60  ;;  %v3033_v60 = vld [vmem:[#allocation8 + $0xa8] sm:$0xff] }
 0x176   :  { %2702 = vmatpush1.bf16.msra.mxu0 %v4640_v61  ;;  %v4695_v61 = vld [vmem:[#allocation5 + $0x748] ss:$28 sps:$4 sm:$0xff]  }
 0x177   :  { %3855 = vmatpush3.bf16.msra.mxu1 %v4644_v62  ;;  %2703 = vmatprep.subr.bf16.mxu0 %v4647_v1  ;;  %v4700_v62 = vld [vmem:[#allocation5 + $0x784] ss:$28 sps:$4 sm:$0xff]   ;;  %v4065_v1 = vpack.c.bf16 %v3015_v58, %v3014_v57 }
 0x178   :  { %3862 = vmatprep.subr.bf16.mxu1 %v4648_v3  ;;  %v4067_v3 = vpack.c.bf16 %v3033_v60, %v3032_v59  ;;  %v4724_v57 = vld [vmem:[#allocation5 + $0x944] ss:$28 sps:$4 sm:$0xff]   ;;  %v4727_v59 = vld [vmem:[#allocation5 + $0x97c] ss:$28 sps:$4 sm:$0xff]  }
 0x179   :  { %v4722_v58 = vld [vmem:[#allocation5 + $0x940] ss:$28 sps:$4 sm:$0xff]   ;;  %v4725_v60 = vld [vmem:[#allocation5 + $0x978] ss:$28 sps:$4 sm:$0xff]  }
 0x17a   :  { %2704 = vmatpush1.bf16.msra.mxu0 %v4645_v5  ;;  %2894 = vmatmul.mubr.bf16.vlgmr.msra.gmra.mrb[16].mxu1 %v5013_v23  ;;  %v3016_v5 = vld [vmem:[#allocation8 + $0x20] sm:$0xff] }
 0x17b   :  { %3863 = vmatpush3.bf16.msra.mxu1 %v4649_v6  ;;  %2705 = vmatprep.subr.bf16.mxu0 %v4652_v7  ;;  %v3017_v6 = vld [vmem:[#allocation8 + $0x28] sm:$0xff]  ;;  %v3034_v7 = vld [vmem:[#allocation8 + $0xb0] sm:$0xff] }
 0x17c   :  { %3864 = vmatprep.subr.bf16.mxu1 %v4653_v8  ;;  %2934 = vmatprep.mubr.bf16.mxu1 %v5016_v31  ;;  %v3035_v8 = vld [vmem:[#allocation8 + $0xb8] sm:$0xff] }
 0x17e   :  { %2706 = vmatpush1.bf16.msra.mxu0 %v4650_v9  ;;  %v4703_v9 = vld [vmem:[#allocation5 + $0x7bc] ss:$28 sps:$4 sm:$0xff]  }
 0x17f   :  { %3865 = vmatpush3.bf16.msra.mxu1 %v4654_v10  ;;  %2707 = vmatprep.subr.bf16.mxu0 %v4657_v12  ;;  %v4069_v10 = vpack.c.bf16 %v3017_v6, %v3016_v5  ;;  %v3018_v12 = vld [vmem:[#allocation8 + $0x30] sm:$0xff]  ;;  %v4736_v5 = vld [vmem:[#allocation5 + $0xa24] ss:$28 sps:$4 sm:$0xff]  }
 0x180   :  { %3866 = vmatprep.subr.bf16.mxu1 %v4658_v14  ;;  %v3019_v14 = vld [vmem:[#allocation8 + $0x38] sm:$0xff] }
 0x181   :  { %v4734_v6 = vld [vmem:[#allocation5 + $0xa20] ss:$28 sps:$4 sm:$0xff]  }
 0x182   :  { %2708 = vmatpush1.bf16.msra.mxu0 %v4655_v54  ;;  %v3036_v54 = vld [vmem:[#allocation8 + $0xc0] sm:$0xff] }
 0x183   :  { %3867 = vmatpush3.bf16.msra.mxu1 %v4659_v15  ;;  %2709 = vmatprep.subr.bf16.mxu0 %v4662_v16  ;;  %v3037_v15 = vld [vmem:[#allocation8 + $0xc8] sm:$0xff]  ;;  %v4706_v16 = vld [vmem:[#allocation5 + $0x7f4] ss:$28 sps:$4 sm:$0xff]  }
 0x184   :  { %3868 = vmatprep.subr.bf16.mxu1 %v4663_v17  ;;  %v4073_v17 = vpack.c.bf16 %v3019_v14, %v3018_v12  ;;  %v3111_v12 = vld [vmem:[#allocation8 + $0x318] sm:$0xff] }
 0x186   :  { %2710 = vmatpush1.bf16.msra.mxu0 %v4660_v18  ;;  %v4075_v18 = vpack.c.bf16 %v3037_v15, %v3036_v54  ;;  %v3112_v54 = vld [vmem:[#allocation8 + $0x320] sm:$0xff]  ;;  %v3113_v15 = vld [vmem:[#allocation8 + $0x328] sm:$0xff] }
 0x187   :  { %3869 = vmatpush3.bf16.msra.mxu1 %v4664_v19  ;;  %2711 = vmatprep.subr.bf16.mxu0 %v4667_v20  ;;  %v3020_v19 = vld [vmem:[#allocation8 + $0x40] sm:$0xff]  ;;  %v3021_v20 = vld [vmem:[#allocation8 + $0x48] sm:$0xff] }
 0x188   :  { %3870 = vmatprep.subr.bf16.mxu1 %v4668_v21  ;;  %v3038_v21 = vld [vmem:[#allocation8 + $0xd0] sm:$0xff] }
 0x18a   :  { %2712 = vmatpush1.bf16.msra.mxu0 %v4665_v22  ;;  %v3039_v22 = vld [vmem:[#allocation8 + $0xd8] sm:$0xff] }
 0x18b   :  { %3871 = vmatpush3.bf16.msra.mxu1 %v4669_v24  ;;  %2713 = vmatprep.subr.bf16.mxu0 %v4672_v25  ;;  %v4704_v24 = vld [vmem:[#allocation5 + $0x7f0] ss:$28 sps:$4 sm:$0xff]  }
 0x18c   :  { %3872 = vmatprep.subr.bf16.mxu1 %v4673_v26  ;;  %v4709_v25 = vld [vmem:[#allocation5 + $0x82c] ss:$28 sps:$4 sm:$0xff]   ;;  %v4077_v26 = vpack.c.bf16 %v3021_v20, %v3020_v19  ;;  %v3116_v20 = vld [vmem:[#allocation8 + $0x340] sm:$0xff] }
 0x18e   :  { %2714 = vmatpush1.bf16.msra.mxu0 %v4670_v27  ;;  %v4079_v27 = vpack.c.bf16 %v3039_v22, %v3038_v21  ;;  %v3117_v21 = vld [vmem:[#allocation8 + $0x348] sm:$0xff] }
 0x18f   :  { %3873 = vmatpush3.bf16.msra.mxu1 %v4674_v28  ;;  %2715 = vmatprep.subr.bf16.mxu0 %v4677_v29  ;;  %v3022_v28 = vld [vmem:[#allocation8 + $0x50] sm:$0xff]  ;;  %v3023_v29 = vld [vmem:[#allocation8 + $0x58] sm:$0xff] }
 0x190   :  { %3874 = vmatprep.subr.bf16.mxu1 %v4678_v30  ;;  %v3040_v30 = vld [vmem:[#allocation8 + $0xe0] sm:$0xff] }
 0x192   :  { %2716 = vmatpush1.bf16.msra.mxu0 %v4675_v32  ;;  %v3041_v32 = vld [vmem:[#allocation8 + $0xe8] sm:$0xff] }
 0x193   :  { %3875 = vmatpush3.bf16.msra.mxu1 %v4679_v33  ;;  %2717 = vmatprep.subr.bf16.mxu0 %v4682_v34  ;;  %v4707_v33 = vld [vmem:[#allocation5 + $0x828] ss:$28 sps:$4 sm:$0xff]  }
 0x194   :  { %3876 = vmatprep.subr.bf16.mxu1 %v4683_v35  ;;  %v4712_v34 = vld [vmem:[#allocation5 + $0x864] ss:$28 sps:$4 sm:$0xff]   ;;  %v4081_v35 = vpack.c.bf16 %v3023_v29, %v3022_v28  ;;  %v3119_v28 = vld [vmem:[#allocation8 + $0x358] sm:$0xff] }
 0x196   :  { %2718 = vmatpush1.bf16.msra.mxu0 %v4680_v37  ;;  %v4083_v37 = vpack.c.bf16 %v3041_v32, %v3040_v30 }
 0x197   :  { %3877 = vmatpush3.bf16.msra.mxu1 %v4684_v38  ;;  %2719 = vmatprep.subr.bf16.mxu0 %v4687_v39  ;;  %v3024_v38 = vld [vmem:[#allocation8 + $0x60] sm:$0xff]  ;;  %v3025_v39 = vld [vmem:[#allocation8 + $0x68] sm:$0xff] }
 0x198   :  { %4018 = vmatprep.subr.bf16.mxu1 %v4900_v46 }
 0x19a   :  { %2720 = vmatpush1.bf16.msra.mxu0 %v4685_v43  ;;  %2935 = vmatmul.mubr.bf16.vlgmr.msra.gmra.mrb[20].mxu1 %v5021_v36  ;;  %v4710_v43 = vld [vmem:[#allocation5 + $0x860] ss:$28 sps:$4 sm:$0xff]  }
 0x19b   :  { %2721 = vmatprep.subr.bf16.mxu0 %v4690_v44  ;;  %4019 = vmatpush3.bf16.msra.mxu1 %v4691_v45  ;;  %v4715_v44 = vld [vmem:[#allocation5 + $0x89c] ss:$28 sps:$4 sm:$0xff]   ;;  %v4085_v45 = vpack.c.bf16 %v3025_v39, %v3024_v38  ;;  %v3121_v38 = vld [vmem:[#allocation8 + $0x368] sm:$0xff] }
 0x19c   :  { %4020 = vmatprep.mubr.msk.bf16.mxu1 %vm4901_vm1, %v4900_v46  ;;  %4060 = vmatprep.subr.bf16.mxu1 %v4059_v47  ;;  %v4087_v46 = vpack.c.bf16 %v3043_v41, %v3042_v40  ;;  %v3026_v47 = vld [vmem:[#allocation8 + $0x70] sm:$0xff] }
 0x19e   :  { %2722 = vmatpush1.bf16.msra.mxu0 %v4688_v48  ;;  %v3027_v48 = vld [vmem:[#allocation8 + $0x78] sm:$0xff] }
 0x19f   :  { %2734 = vmatprep.subr.bf16.mxu0 %v4694_v49  ;;  %v3060_v49 = vld [vmem:[#allocation8 + $0x180] sm:$0xff]  ;;  %v4089_v53 = vpack.c.bf16 %v3027_v48, %v3026_v47 }
 0x1a0   :  { %v3044_v48 = vld [vmem:[#allocation8 + $0x100] sm:$0xff] }
 0x1a1   :  { %2724 = vmatmul.mubr.bf16.vlgmr.msra.gmra.mrb[4].mxu0 %v5013_v23  ;;  %v4698_v23 = vld [vmem:[#allocation5 + $0x780] ss:$28 sps:$4 sm:$0xff]  }
 0x1a2   :  { %2735 = vmatpush1.bf16.msra.mxu0 %v4692_v13  ;;  %4021 = vmatmul.mubr.msk.bf16.vlgmr.msra.gmra.mrb[24].mxu1 %vm2300_vm0, %v4997_v11  ;;  %v4071_v11 = vpack.c.bf16 %v3035_v8, %v3034_v7  ;;  %v4091_v13 = vpack.c.bf16 %v3061_v50, %v3060_v49  ;;  %v4739_v7 = vld [vmem:[#allocation5 + $0xa5c] ss:$28 sps:$4 sm:$0xff]   ;;  %v3108_v8 = vld [vmem:[#allocation8 + $0x300] sm:$0xff] }
 0x1a3   :  { %2736 = vmatprep.subr.bf16.mxu0 %v4697_v55  ;;  %4062 = vmatpush3.bf16.msra.mxu1 %v4061_v42  ;;  %v4716_v55 = vld [vmem:[#allocation5 + $0x8d0] ss:$28 sps:$4 sm:$0xff]  }
 0x1a4   :  { %2766 = vmatprep.mubr.bf16.mxu0 %v5016_v31  ;;  %4064 = vmatprep.subr.bf16.mxu1 %v4063_v56  ;;  %v4701_v31 = vld [vmem:[#allocation5 + $0x7b8] ss:$28 sps:$4 sm:$0xff]   ;;  %v4721_v42 = vld [vmem:[#allocation5 + $0x90c] ss:$28 sps:$4 sm:$0xff]  }
 0x1a5   :  { %v4719_v56 = vld [vmem:[#allocation5 + $0x908] ss:$28 sps:$4 sm:$0xff]  }
 0x1a6   :  { %2737 = vmatpush1.bf16.msra.mxu0 %v4695_v61  ;;  %v4730_v61 = vld [vmem:[#allocation5 + $0x9b4] ss:$28 sps:$4 sm:$0xff]  }
 0x1a7   :  { %2738 = vmatprep.subr.bf16.mxu0 %v4700_v62  ;;  %4066 = vmatpush3.bf16.msra.mxu1 %v4065_v1  ;;  %v4728_v62 = vld [vmem:[#allocation5 + $0x9b0] ss:$28 sps:$4 sm:$0xff]  }
 0x1a8   :  { %4068 = vmatprep.subr.bf16.mxu1 %v4067_v3  ;;  %v4733_v1 = vld [vmem:[#allocation5 + $0x9ec] ss:$28 sps:$4 sm:$0xff]  }
 0x1a9   :  { %v4731_v3 = vld [vmem:[#allocation5 + $0x9e8] ss:$28 sps:$4 sm:$0xff]  }
 0x1aa   :  { %2739 = vmatpush1.bf16.msra.mxu0 %v4698_v23  ;;  %v3109_v23 = vld [vmem:[#allocation8 + $0x308] sm:$0xff] }
 0x1ab   :  { %2740 = vmatprep.subr.bf16.mxu0 %v4703_v9  ;;  %4070 = vmatpush3.bf16.msra.mxu1 %v4069_v10  ;;  %v4737_v9 = vld [vmem:[#allocation5 + $0xa58] ss:$28 sps:$4 sm:$0xff]   ;;  %v4155_v10 = vpack.c.bf16 %v3109_v23, %v3108_v8  ;;  %v3048_v23 = vld [vmem:[#allocation8 + $0x120] sm:$0xff] }
 0x1ac   :  { %4072 = vmatprep.subr.bf16.mxu1 %v4071_v11  ;;  %v3110_v11 = vld [vmem:[#allocation8 + $0x310] sm:$0xff] }
 0x1ad   :  { %v4159_v14 = vpack.c.bf16 %v3111_v12, %v3110_v11  ;;  %v3067_v11 = vld [vmem:[#allocation8 + $0x1b8] sm:$0xff] }
 0x1ae   :  { %2741 = vmatpush1.bf16.msra.mxu0 %v4701_v31  ;;  %v4163_v31 = vpack.c.bf16 %v3113_v15, %v3112_v54 }
 0x1af   :  { %2742 = vmatprep.subr.bf16.mxu0 %v4706_v16  ;;  %4074 = vmatpush3.bf16.msra.mxu1 %v4073_v17  ;;  %v3114_v16 = vld [vmem:[#allocation8 + $0x330] sm:$0xff]  ;;  %v3115_v17 = vld [vmem:[#allocation8 + $0x338] sm:$0xff] }
 0x1b0   :  { %4076 = vmatprep.subr.bf16.mxu1 %v4075_v18  ;;  %v501_v18 = vlaneseq  ;;  %v4167_v19 = vpack.c.bf16 %v3115_v17, %v3114_v16  ;;  %v3051_v16 = vld [vmem:[#allocation8 + $0x138] sm:$0xff] }
 0x1b2   :  { %2743 = vmatpush1.bf16.msra.mxu0 %v4704_v24  ;;  %v5053_v22 = vshrl.u32 %v501_v18, 7  ;;  %v4171_v24 = vpack.c.bf16 %v3117_v21, %v3116_v20  ;;  %v3068_v18 = vld [vmem:[#allocation8 + $0x1c0] sm:$0xff] }
 0x1b3   :  { %2744 = vmatprep.subr.bf16.mxu0 %v4709_v25  ;;  %4078 = vmatpush3.bf16.msra.mxu1 %v4077_v26  ;;  %v5056_v26 = vld [vmem:[#allocation7] sm:$0xff] }
 0x1b4   :  { %4080 = vmatprep.subr.bf16.mxu1 %v4079_v27  ;;  %v503_v25 = vsub.s32 0, %v5053_v22  ;;  %v3118_v27 = vld [vmem:[#allocation8 + $0x350] sm:$0xff] }
 0x1b5   :  { %v4175_v29 = vpack.c.bf16 %v3119_v28, %v3118_v27  ;;  %v3052_v28 = vld [vmem:[#allocation8 + $0x140] sm:$0xff] }
 0x1b6   :  { %2745 = vmatpush1.bf16.msra.mxu0 %v4707_v33  ;;  %v504_v30 = vrot.slane %v5056_v26, %v503_v25 }
 0x1b7   :  { %2746 = vmatprep.subr.bf16.mxu0 %v4712_v34  ;;  %4082 = vmatpush3.bf16.msra.mxu1 %v4081_v35 }
 0x1b8   :  { %4084 = vmatprep.subr.bf16.mxu1 %v4083_v37  ;;  %v3120_v37 = vld [vmem:[#allocation8 + $0x360] sm:$0xff] }
 0x1b9   :  { %v4179_v41 = vpack.c.bf16 %v3121_v38, %v3120_v37  ;;  %v3054_v38 = vld [vmem:[#allocation8 + $0x150] sm:$0xff] }
 0x1ba   :  { %2747 = vmatpush1.bf16.msra.mxu0 %v4710_v43 }
 0x1bb   :  { %2748 = vmatprep.subr.bf16.mxu0 %v4715_v44  ;;  %4086 = vmatpush3.bf16.msra.mxu1 %v4085_v45 }
 0x1bc   :  { %4088 = vmatprep.subr.bf16.mxu1 %v4087_v46 }
 0x1be   :  { %2749 = vmatpush1.bf16.msra.mxu0 %v4713_v51  ;;  %v3045_v51 = vld [vmem:[#allocation8 + $0x108] sm:$0xff] }
 0x1bf   :  { %2750 = vmatprep.subr.bf16.mxu0 %v4718_v52  ;;  %4090 = vmatpush3.bf16.msra.mxu1 %v4089_v53  ;;  %v3122_v52 = vld [vmem:[#allocation8 + $0x370] sm:$0xff]  ;;  %v3123_v53 = vld [vmem:[#allocation8 + $0x378] sm:$0xff] }
 0x1c0   :  { %4092 = vmatprep.subr.bf16.mxu1 %v4091_v13 }
 0x1c2   :  { %2751 = vmatpush1.bf16.msra.mxu0 %v4716_v55 }
 0x1c3   :  { %2752 = vmatprep.subr.bf16.mxu0 %v4721_v42  ;;  %v3062_v42 = vld [vmem:[#allocation8 + $0x190] sm:$0xff] }
 0x1c6   :  { %2753 = vmatpush1.bf16.msra.mxu0 %v4719_v56  ;;  %v3063_v56 = vld [vmem:[#allocation8 + $0x198] sm:$0xff] }
 0x1c7   :  { %2754 = vmatprep.subr.bf16.mxu0 %v4724_v57 }
 0x1ca   :  { %2755 = vmatpush1.bf16.msra.mxu0 %v4722_v58 }
 0x1cb   :  { %2756 = vmatprep.subr.bf16.mxu0 %v4727_v59  ;;  %v4093_v59 = vpack.c.bf16 %v3045_v51, %v3044_v48  ;;  %v3057_v51 = vld [vmem:[#allocation8 + $0x168] sm:$0xff] }
 0x1ce   :  { %2757 = vmatpush1.bf16.msra.mxu0 %v4725_v60 }
 0x1cf   :  { %2758 = vmatprep.subr.bf16.mxu0 %v4730_v61  ;;  %v4095_v61 = vpack.c.bf16 %v3063_v56, %v3062_v42  ;;  %v3058_v56 = vld [vmem:[#allocation8 + $0x170] sm:$0xff] }
 0x1d2   :  { %2759 = vmatpush1.bf16.msra.mxu0 %v4728_v62  ;;  %v3046_v62 = vld [vmem:[#allocation8 + $0x110] sm:$0xff] }
 0x1d3   :  { %2760 = vmatprep.subr.bf16.mxu0 %v4733_v1  ;;  %v3047_v1 = vld [vmem:[#allocation8 + $0x118] sm:$0xff] }
 0x1d6   :  { %2761 = vmatpush1.bf16.msra.mxu0 %v4731_v3  ;;  %v3064_v3 = vld [vmem:[#allocation8 + $0x1a0] sm:$0xff] }
 0x1d7   :  { %2762 = vmatprep.subr.bf16.mxu0 %v4736_v5  ;;  %v3065_v5 = vld [vmem:[#allocation8 + $0x1a8] sm:$0xff] }
 0x1d8   :  { %v4099_v8 = vpack.c.bf16 %v3065_v5, %v3064_v3  ;;  %v3094_v5 = vld [vmem:[#allocation8 + $0x290] sm:$0xff] }
 0x1da   :  { %2763 = vmatpush1.bf16.msra.mxu0 %v4734_v6  ;;  %v4097_v6 = vpack.c.bf16 %v3047_v1, %v3046_v62  ;;  %v3076_v1 = vld [vmem:[#allocation8 + $0x200] sm:$0xff] }
 0x1db   :  { %2764 = vmatprep.subr.bf16.mxu0 %v4739_v7 }
 0x1de   :  { %2765 = vmatpush1.bf16.msra.mxu0 %v4737_v9  ;;  %v3049_v9 = vld [vmem:[#allocation8 + $0x128] sm:$0xff] }
 0x1df   :  { %4156 = vmatprep.subr.bf16.mxu0 %v4155_v10 }
 0x1e1   :  { %2767 = vmatmul.mubr.bf16.vlgmr.msra.gmra.mrb[4].mxu0 %v5021_v36  ;;  %v507_v36 = vsub.s32 1, %v5053_v22 }
 0x1e2   :  { %4158 = vmatpush3.bf16.msra.mxu0 %v4155_v10  ;;  %v3066_v10 = vld [vmem:[#allocation8 + $0x1b0] sm:$0xff] }
 0x1e3   :  { %4160 = vmatprep.subr.bf16.mxu0 %v4159_v14  ;;  %v508_v32 = vrot.slane %v5056_v26, %v507_v36  ;;  %v4103_v15 = vpack.c.bf16 %v3067_v11, %v3066_v10  ;;  %v3079_v10 = vld [vmem:[#allocation8 + $0x218] sm:$0xff] }
 0x1e6   :  { %4162 = vmatpush3.bf16.msra.mxu0 %v4159_v14  ;;  %v4101_v14 = vpack.c.bf16 %v3049_v9, %v3048_v23  ;;  %v3078_v9 = vld [vmem:[#allocation8 + $0x210] sm:$0xff] }
 0x1e7   :  { %4164 = vmatprep.subr.bf16.mxu0 %v4163_v31 }
 0x1ea   :  { %4166 = vmatpush3.bf16.msra.mxu0 %v4163_v31  ;;  %v3050_v31 = vld [vmem:[#allocation8 + $0x130] sm:$0xff] }
 0x1eb   :  { %4168 = vmatprep.subr.bf16.mxu0 %v4167_v19  ;;  %v4105_v25 = vpack.c.bf16 %v3051_v16, %v3050_v31  ;;  %v3080_v16 = vld [vmem:[#allocation8 + $0x220] sm:$0xff] }
 0x1ee   :  { %4170 = vmatpush3.bf16.msra.mxu0 %v4167_v19  ;;  %v3069_v19 = vld [vmem:[#allocation8 + $0x1c8] sm:$0xff] }
 0x1ef   :  { %4172 = vmatprep.subr.bf16.mxu0 %v4171_v24  ;;  %v4107_v27 = vpack.c.bf16 %v3069_v19, %v3068_v18  ;;  %v3098_v18 = vld [vmem:[#allocation8 + $0x2b0] sm:$0xff]  ;;  %v3099_v19 = vld [vmem:[#allocation8 + $0x2b8] sm:$0xff] }
 0x1f2   :  { %4174 = vmatpush3.bf16.msra.mxu0 %v4171_v24 }
 0x1f3   :  { %4176 = vmatprep.subr.bf16.mxu0 %v4175_v29 }
 0x1f4   :  { %v2424_v33 = vpop.f32.mrb[0].mxu0 }
 0x1f5   :  { %v4187_v34 = vadd.f32 %v2424_v33, %v504_v30  ;;  %v2426_v35 = vpop.f32.mrb[1].mxu0 }
 0x1f6   :  { %v4189_v39 = vadd.f32 %v2426_v35, %v508_v32  ;;  %v2428_v40 = vpop.f32.mrb[2].mxu0  ;;  %4178 = vmatpush3.bf16.msra.mxu0 %v4175_v29  ;;  %v3053_v29 = vld [vmem:[#allocation8 + $0x148] sm:$0xff]  ;;  %v511_v35 = vsub.s32 2, %v5053_v22 }
 0x1f7   :  { %v4188_v43 = vadd.f32 %v4187_v34, %v5030_v63  ;;  %v4191_v44 = vadd.f32 %v2428_v40, %v504_v30  ;;  %v2430_v45 = vpop.f32.mrb[3].mxu0  ;;  %4180 = vmatprep.subr.bf16.mxu0 %v4179_v41  ;;  %v4183_v63 = vpack.c.bf16 %v3123_v53, %v3122_v52  ;;  %v3070_v30 = vld [vmem:[#allocation8 + $0x1d0] sm:$0xff]  ;;  %v4109_v34 = vpack.c.bf16 %v3053_v29, %v3052_v28  ;;  %v3075_v53 = vld [vmem:[#allocation8 + $0x1f8] sm:$0xff] }
 0x1f8   :  { %v4190_v46 = vadd.f32 %v4189_v39, %v5034_v2  ;;  %v4193_v47 = vadd.f32 %v2430_v45, %v508_v32  ;;  %v3071_v32 = vld [vmem:[#allocation8 + $0x1d8] sm:$0xff]  ;;  %v512_v48 = vrot.slane %v5056_v26, %v511_v35  ;;  %v3074_v52 = vld [vmem:[#allocation8 + $0x1f0] sm:$0xff] }
 0x1f9   :  { %v2984_v49 = vmul.f32 0.2, %v4188_v43  ;;  %v4192_v50 = vadd.f32 %v4191_v44, %v5036_v0  ;;  %v4111_v37 = vpack.c.bf16 %v3071_v32, %v3070_v30  ;;  %v3055_v39 = vld [vmem:[#allocation8 + $0x158] sm:$0xff]  ;;  %v4119_v42 = vpack.c.bf16 %v3075_v53, %v3074_v52  ;;  %v3084_v30 = vld [vmem:[#allocation8 + $0x240] sm:$0xff]  ;;  %v3085_v32 = vld [vmem:[#allocation8 + $0x248] sm:$0xff] }
 0x1fa   :  { %v2985_v13 = vmul.f32 0.2, %v4190_v46  ;;  %v4194_v55 = vadd.f32 %v4193_v47, %v5039_v4  ;;  %4182 = vmatpush3.bf16.msra.mxu0 %v4179_v41  ;;  %v515_v4 = vsub.s32 3, %v5053_v22  ;;  %v3072_v41 = vld [vmem:[#allocation8 + $0x1e0] sm:$0xff]  ;;  %v4141_v35 = vpack.c.bf16 %v3085_v32, %v3084_v30  ;;  %v3105_v53 = vld [vmem:[#allocation8 + $0x2e8] sm:$0xff] }
 0x1fb   :  { %4184 = vmatprep.subr.bf16.mxu0 %v4183_v63  ;;  %v2998_v2 = vmax.f32 %v4188_v43, %v2984_v49  ;;  %v2991_v60 = vmul.f32 0.2, %v4192_v50  ;;  %v3073_v43 = vld [vmem:[#allocation8 + $0x1e8] sm:$0xff]  ;;  %v3104_v52 = vld [vmem:[#allocation8 + $0x2e0] sm:$0xff]  ;;  %v523_v30 = vsub.s32 5, %v5053_v22 }
 0x1fc   :  { %v2992_v57 = vmul.f32 0.2, %v4194_v55  ;;  %v2999_v58 = vmax.f32 %v4190_v46, %v2985_v13  ;;  %v516_v12 = vrot.slane %v5056_v26, %v515_v4  ;;  %v4113_v46 = vpack.c.bf16 %v3055_v39, %v3054_v38  ;;  %v3095_v4 = vld [vmem:[#allocation8 + $0x298] sm:$0xff] }
 0x1fd   :  { %v3005_v7 = vmax.f32 %v4192_v50, %v2991_v60  ;;  %v4115_v49 = vpack.c.bf16 %v3073_v43, %v3072_v41  ;;  %v3056_v50 = vld [vmem:[#allocation8 + $0x160] sm:$0xff]  ;;  %v4127_v23 = vpack.c.bf16 %v3095_v4, %v3094_v5 }
 0x1fe   :  { %3195 = vmatprep.mubr.f32.mxu1 %v2999_v58  ;;  %v3006_v0 = vmax.f32 %v4194_v55, %v2992_v57  ;;  %4186 = vmatpush3.bf16.msra.mxu0 %v4183_v63  ;;  %v4117_v13 = vpack.c.bf16 %v3057_v51, %v3056_v50  ;;  %v3059_v63 = vld [vmem:[#allocation8 + $0x178] sm:$0xff]  ;;  %v3092_v58 = vld [vmem:[#allocation8 + $0x280] sm:$0xff] }
 0x1ff   :  { %3196 = vmatmul.mubr.f32.vlgmr.msra.gmra.mrb[28].mxu1 %v2998_v2  ;;  %v4121_v2 = vpack.c.bf16 %v3059_v63, %v3058_v56  ;;  %v3087_v50 = vld [vmem:[#allocation8 + $0x258] sm:$0xff]  ;;  %v3106_v63 = vld [vmem:[#allocation8 + $0x2f0] sm:$0xff] }
 0x200   :  { %4094 = vmatpush3.bf16.msra.mxu1 %v4093_v59  ;;  %3200 = vmatprep.mubr.f32.mxu1 %v3006_v0  ;;  %v3093_v59 = vld [vmem:[#allocation8 + $0x288] sm:$0xff] }
 0x201   :  { %4096 = vmatprep.subr.bf16.mxu1 %v4095_v61  ;;  %v4123_v62 = vpack.c.bf16 %v3093_v59, %v3092_v58  ;;  %v3077_v0 = vld [vmem:[#allocation8 + $0x208] sm:$0xff]  ;;  %v3090_v59 = vld [vmem:[#allocation8 + $0x270] sm:$0xff] }
 0x203   :  { %3201 = vmatmul.mubr.f32.gmra.mrb[30].mxu1 %v3005_v7 }
 0x204   :  { %4098 = vmatpush3.bf16.msra.mxu1 %v4097_v6  ;;  %v4125_v6 = vpack.c.bf16 %v3077_v0, %v3076_v1 }
 0x205   :  { %v2639_v54 = vpop.f32.mrb[4].mxu1  ;;  %4100 = vmatprep.subr.bf16.mxu1 %v4099_v8 }
 0x206   :  { %v2641_v17 = vpop.f32.mrb[5].mxu1  ;;  %v4195_v55 = vadd.f32 %v2639_v54, %v512_v48  ;;  %v4129_v54 = vpack.c.bf16 %v3079_v10, %v3078_v9 }
 0x207   :  { %v4196_v20 = vadd.f32 %v2641_v17, %v516_v12  ;;  %v2643_v21 = vpop.f32.mrb[6].mxu1  ;;  %v3081_v17 = vld [vmem:[#allocation8 + $0x228] sm:$0xff] }
 0x208   :  { %v2645_v24 = vpop.f32.mrb[7].mxu1  ;;  %4102 = vmatpush3.bf16.msra.mxu1 %v4101_v14  ;;  %v2986_v60 = vmul.f32 0.2, %v4195_v55  ;;  %v4197_v61 = vadd.f32 %v2643_v21, %v512_v48  ;;  %v3097_v14 = vld [vmem:[#allocation8 + $0x2a8] sm:$0xff]  ;;  %v4135_v21 = vpack.c.bf16 %v3099_v19, %v3098_v18 }
 0x209   :  { %v2987_v36 = vmul.f32 0.2, %v4196_v20  ;;  %4104 = vmatprep.subr.bf16.mxu1 %v4103_v15  ;;  %v4198_v57 = vadd.f32 %v2645_v24, %v516_v12  ;;  %v3096_v12 = vld [vmem:[#allocation8 + $0x2a0] sm:$0xff]  ;;  %v3082_v24 = vld [vmem:[#allocation8 + $0x230] sm:$0xff] }
 0x20a   :  { %v3000_v7 = vmax.f32 %v4195_v55, %v2986_v60  ;;  %v2993_v8 = vmul.f32 0.2, %v4197_v61  ;;  %v4131_v31 = vpack.c.bf16 %v3097_v14, %v3096_v12  ;;  %v3088_v55 = vld [vmem:[#allocation8 + $0x260] sm:$0xff] }
 0x20b   :  { %v3001_v33 = vmax.f32 %v4196_v20, %v2987_v36  ;;  %v2994_v3 = vmul.f32 0.2, %v4198_v57  ;;  %v4133_v20 = vpack.c.bf16 %v3081_v17, %v3080_v16  ;;  %v3100_v36 = vld [vmem:[#allocation8 + $0x2c0] sm:$0xff] }
 0x20c   :  { %4106 = vmatpush3.bf16.msra.mxu1 %v4105_v25  ;;  %v3007_v15 = vmax.f32 %v4197_v61, %v2993_v8  ;;  %v3083_v25 = vld [vmem:[#allocation8 + $0x238] sm:$0xff]  ;;  %v527_v61 = vsub.s32 6, %v5053_v22 }
 0x20d   :  { %3270 = vmatprep.mubr.f32.mxu1 %v3001_v33  ;;  %4108 = vmatprep.subr.bf16.mxu1 %v4107_v27  ;;  %v5068_v40 = vpop.f32.mrb[8].mxu1  ;;  %v3008_v11 = vmax.f32 %v4198_v57, %v2994_v3  ;;  %v3101_v27 = vld [vmem:[#allocation8 + $0x2c8] sm:$0xff]  ;;  %v4137_v28 = vpack.c.bf16 %v3083_v25, %v3082_v24  ;;  %v3102_v33 = vld [vmem:[#allocation8 + $0x2d0] sm:$0xff]  ;;  %v3107_v57 = vld [vmem:[#allocation8 + $0x2f8] sm:$0xff] }
 0x20e   :  { %v5070_v44 = vpop.f32.mrb[9].mxu1  ;;  %v4139_v29 = vpack.c.bf16 %v3101_v27, %v3100_v36  ;;  %v4151_v58 = vpack.c.bf16 %v3107_v57, %v3106_v63 }
 0x20f   :  { %v5072_v45 = vpop.f32.mrb[10].mxu1 }
 0x210   :  { %4110 = vmatpush3.bf16.msra.mxu1 %v4109_v34  ;;  %v5074_v47 = vpop.f32.mrb[11].mxu1  ;;  %v3103_v34 = vld [vmem:[#allocation8 + $0x2d8] sm:$0xff] }
 0x211   :  { %4112 = vmatprep.subr.bf16.mxu1 %v4111_v37  ;;  %v4143_v38 = vpack.c.bf16 %v3103_v34, %v3102_v33  ;;  %v524_v33 = vrot.slane %v5056_v26, %v523_v30 }
 0x214   :  { %4114 = vmatpush3.bf16.msra.mxu1 %v4113_v46 }
 0x215   :  { %4116 = vmatprep.subr.bf16.mxu1 %v4115_v49  ;;  %v3086_v49 = vld [vmem:[#allocation8 + $0x250] sm:$0xff] }
 0x216   :  { %v4145_v51 = vpack.c.bf16 %v3087_v50, %v3086_v49 }
 0x218   :  { %4118 = vmatpush3.bf16.msra.mxu1 %v4117_v13  ;;  %v4147_v13 = vpack.c.bf16 %v3105_v53, %v3104_v52 }
 0x219   :  { %4120 = vmatprep.subr.bf16.mxu1 %v4119_v42  ;;  %v3089_v42 = vld [vmem:[#allocation8 + $0x268] sm:$0xff] }
 0x21a   :  { %v4149_v56 = vpack.c.bf16 %v3089_v42, %v3088_v55 }
 0x21c   :  { %4122 = vmatpush3.bf16.msra.mxu1 %v4121_v2  ;;  %v3091_v2 = vld [vmem:[#allocation8 + $0x278] sm:$0xff] }
 0x21d   :  { %4124 = vmatprep.subr.bf16.mxu1 %v4123_v62  ;;  %v4153_v60 = vpack.c.bf16 %v3091_v2, %v3090_v59  ;;  %v528_v62 = vrot.slane %v5056_v26, %v527_v61 }
 0x21f   :  { %3271 = vmatmul.mubr.f32.vlgmr.msra.gmra.mrb[32].mxu1 %v3000_v7 }
 0x220   :  { %3275 = vmatprep.mubr.f32.mxu1 %v3008_v11  ;;  %4126 = vmatpush3.bf16.msra.mxu1 %v4125_v6 }
 0x221   :  { %4128 = vmatprep.subr.bf16.mxu1 %v4127_v23 }
 0x223   :  { %3276 = vmatmul.mubr.f32.gmra.mrb[34].mxu1 %v3007_v15 }
 0x224   :  { %4130 = vmatpush3.bf16.msra.mxu1 %v4129_v54 }
 0x225   :  { %4132 = vmatprep.subr.bf16.mxu1 %v4131_v31 }
 0x228   :  { %4134 = vmatpush3.bf16.msra.mxu1 %v4133_v20 }
 0x229   :  { %4136 = vmatprep.subr.bf16.mxu1 %v4135_v21 }
 0x22c   :  { %4138 = vmatpush3.bf16.msra.mxu1 %v4137_v28 }
 0x22d   :  { %v3834_v37 = vpop.f32.mrb[12].mxu1  ;;  %4140 = vmatprep.subr.bf16.mxu1 %v4139_v29  ;;  %v519_v29 = vsub.s32 4, %v5053_v22 }
 0x22e   :  { %v3835_v39 = vpop.f32.mrb[13].mxu1 }
 0x22f   :  { %v3836_v41 = vadd.f32 %v3835_v39, %v3834_v37  ;;  %v3837_v43 = vpop.f32.mrb[14].mxu1  ;;  %v520_v32 = vrot.slane %v5056_v26, %v519_v29 }
 0x230   :  { %v3838_v46 = vpop.f32.mrb[15].mxu1  ;;  %4142 = vmatpush3.bf16.msra.mxu1 %v4141_v35 }
 0x231   :  { %v3839_v48 = vadd.f32 %v3838_v46, %v3837_v43  ;;  %4144 = vmatprep.subr.bf16.mxu1 %v4143_v38  ;;  %v2855_v1 = vadd.f32 %v3836_v41, %v528_v62 }
 0x233   :  { %v2858_v5 = vadd.f32 %v3839_v48, %v528_v62 }
 0x234   :  { %4146 = vmatpush3.bf16.msra.mxu1 %v4145_v51 }
 0x235   :  { %4148 = vmatprep.subr.bf16.mxu1 %v4147_v13 }
 0x238   :  { %4150 = vmatpush3.bf16.msra.mxu1 %v4149_v56 }
 0x239   :  { %4152 = vmatprep.subr.bf16.mxu1 %v4151_v58 }
 0x23c   :  { %4154 = vmatpush3.bf16.msra.mxu1 %v4153_v60 }
 0x24d   :  { %v3856_v0 = vpop.f32.mrb[16].mxu1 }
 0x24e   :  { %v3857_v3 = vpop.f32.mrb[17].mxu1 }
 0x24f   :  { %v3858_v4 = vadd.f32 %v3857_v3, %v3856_v0  ;;  %v3859_v6 = vpop.f32.mrb[18].mxu1 }
 0x250   :  { %v3860_v7 = vpop.f32.mrb[19].mxu1 }
 0x251   :  { %v2896_v8 = vadd.f32 %v3858_v4, %v2855_v1  ;;  %v3861_v23 = vadd.f32 %v3860_v7, %v3859_v6 }
 0x253   :  { %v2899_v9 = vadd.f32 %v3861_v23, %v2858_v5 }
 0x26d   :  { %v3878_v10 = vpop.f32.mrb[20].mxu1 }
 0x26e   :  { %v3879_v11 = vpop.f32.mrb[21].mxu1 }
 0x26f   :  { %v3880_v12 = vadd.f32 %v3879_v11, %v3878_v10  ;;  %v3881_v14 = vpop.f32.mrb[22].mxu1 }
 0x270   :  { %v3882_v54 = vpop.f32.mrb[23].mxu1 }
 0x271   :  { %v3883_v15 = vadd.f32 %v3882_v54, %v3881_v14  ;;  %v2937_v31 = vadd.f32 %v3880_v12, %v2896_v8 }
 0x273   :  { %v2940_v16 = vadd.f32 %v3883_v15, %v2899_v9 }
 0x275   :  { %v2977_v17 = vpop.f32.mrb[24].mxu1 }
 0x276   :  { %v2978_v18 = vadd.f32 %v2977_v17, %v2937_v31  ;;  %v4022_v19 = vpop.f32.mrb[25].mxu1 }
 0x277   :  { %v2980_v20 = vpop.f32.mrb[26].mxu1 }
 0x278   :  { %v2990_v21 = vmul.f32 0.2, %v2978_v18  ;;  %v2981_v24 = vadd.f32 %v2980_v20, %v2940_v16  ;;  %v4023_v25 = vpop.f32.mrb[27].mxu1 }
 0x27a   :  { %v3004_v36 = vmax.f32 %v2978_v18, %v2990_v21  ;;  %v2997_v27 = vmul.f32 0.2, %v2981_v24 }
 0x27c   :  { %v3011_v28 = vmax.f32 %v2981_v24, %v2997_v27  ;;  %4056 = vmatprep.mubr.f32.mxu0 %v3004_v36 }
 0x27e   :  { %4057 = vmatmul.mubr.f32.vlgmr.msra.gmra.mrb[8].mxu0 %v3011_v28 }
 0x2b4   :  { %v2768_v34 = vpop.f32.mrb[4].mxu0 }
 0x2b5   :  { %v4199_v35 = vadd.f32 %v2768_v34, %v520_v32  ;;  %v2770_v37 = vpop.f32.mrb[5].mxu0 }
 0x2b6   :  { %v4201_v38 = vadd.f32 %v2770_v37, %v524_v33  ;;  %v2772_v39 = vpop.f32.mrb[6].mxu0 }
 0x2b7   :  { %v4200_v41 = vadd.f32 %v4199_v35, %v5068_v40  ;;  %v4203_v43 = vadd.f32 %v2772_v39, %v520_v32  ;;  %v2774_v46 = vpop.f32.mrb[7].mxu0 }
 0x2b8   :  { %v4202_v48 = vadd.f32 %v4201_v38, %v5070_v44  ;;  %v4205_v49 = vadd.f32 %v2774_v46, %v524_v33 }
 0x2b9   :  { %v2988_v50 = vmul.f32 0.2, %v4200_v41  ;;  %v4204_v51 = vadd.f32 %v4203_v43, %v5072_v45  ;;  %v3817_v45 = vld [vmem:[#allocation10] ss:$0 sm:$0xff] }
 0x2ba   :  { %v2989_v22 = vmul.f32 0.2, %v4202_v48  ;;  %v4206_v52 = vadd.f32 %v4205_v49, %v5074_v47 }
 0x2bb   :  { %v3002_v13 = vmax.f32 %v4200_v41, %v2988_v50  ;;  %v2995_v55 = vmul.f32 0.2, %v4204_v51 }
 0x2bc   :  { %v2996_v53 = vmul.f32 0.2, %v4206_v52  ;;  %v3003_v26 = vmax.f32 %v4202_v48, %v2989_v22 }
 0x2bd   :  { %v3009_v40 = vmax.f32 %v4204_v51, %v2995_v55 }
 0x2be   :  { %3345 = vmatprep.mubr.f32.mxu1 %v3003_v26  ;;  %v3010_v42 = vmax.f32 %v4206_v52, %v2996_v53 }
 0x2bf   :  { %3346 = vmatmul.mubr.f32.vlgmr.msra.gmra.mrb[36].mxu1 %v3002_v13 }
 0x2c0   :  { %3350 = vmatprep.mubr.f32.mxu1 %v3010_v42 }
 0x2c3   :  { %3351 = vmatmul.mubr.f32.gmra.mrb[38].mxu1 %v3009_v40 }
 0x2d2   :  { %v3918_v56 = vpop.f32.mrb[28].mxu1 }
 0x2d3   :  { %v3919_v63 = vpop.f32.mrb[29].mxu1 }
 0x2d4   :  { %v3920_v44 = vadd.f32 %v3919_v63, %v3918_v56 }
 0x2d6   :  { %v3921_v57 = vpop.f32.mrb[30].mxu1  ;;  %v3198_v47 = vadd.f32 %v3920_v44, %v3817_v45 }
 0x2d7   :  { %v3922_v58 = vpop.f32.mrb[31].mxu1 }
 0x2d8   :  { %v3923_v59 = vadd.f32 %v3922_v58, %v3921_v57 }
 0x2da   :  { %v3203_v3 = vadd.f32 %v3923_v59, %v3817_v45 }
 0x2f2   :  { %v3956_v2 = vpop.f32.mrb[32].mxu1 }
 0x2f3   :  { %v3957_v60 = vpop.f32.mrb[33].mxu1 }
 0x2f4   :  { %v3958_v61 = vadd.f32 %v3957_v60, %v3956_v2 }
 0x2f6   :  { %v3273_v62 = vadd.f32 %v3958_v61, %v3198_v47  ;;  %v3959_v1 = vpop.f32.mrb[34].mxu1 }
 0x2f7   :  { %v3960_v0 = vpop.f32.mrb[35].mxu1 }
 0x2f8   :  { %v3961_v5 = vadd.f32 %v3960_v0, %v3959_v1 }
 0x2fa   :  { %v3278_v4 = vadd.f32 %v3961_v5, %v3203_v3 }
 0x351   :  { %v4058_v6 = vpop.f32.mrb[8].mxu0 }
 0x352   :  { %v3422_v7 = vpop.f32.mrb[9].mxu0 }
 0x392   :  { %v3994_v8 = vpop.f32.mrb[36].mxu1 }
 0x393   :  { %v3995_v23 = vpop.f32.mrb[37].mxu1 }
 0x394   :  { %v3996_v9 = vadd.f32 %v3995_v23, %v3994_v8 }
 0x396   :  { %v3348_v10 = vadd.f32 %v3996_v9, %v3273_v62  ;;  %v3997_v11 = vpop.f32.mrb[38].mxu1 }
 0x397   :  { %v3998_v12 = vpop.f32.mrb[39].mxu1 }
 0x398   :  { %v3999_v14 = vadd.f32 %v3998_v12, %v3997_v11  ;;  %v3423_v54 = vadd.f32 %v3422_v7, %v3348_v10 }
 0x39a   :  { %v3353_v15 = vadd.f32 %v3999_v14, %v3278_v4  ;;  %3431 = vmax.xlane.f32.xlu0 %v3423_v54 }
 0x39c   :  { %v3428_v31 = vadd.f32 %v4058_v6, %v3353_v15 }
 0x39e   :  { %3433 = vmax.xlane.f32.xlu0 %v3428_v31 }
 0x427   :  { %v3432_v16 = vpop.xlane.xlu0 %3431 }
 0x428   :  { %v3435_v17 = vsub.f32 %v3423_v54, %v3432_v16 }
 0x42a   :  { %v3437_v18 = vmul.f32 1.442695, %v3435_v17 }
 0x42b   :  { %v3434_v19 = vpop.xlane.xlu0 %3433 }
 0x42c   :  { %4740 = vpow2.f32 %v3437_v18  ;;  %v3436_v20 = vsub.f32 %v3428_v31, %v3434_v19 }
 0x42e   :  { %v3439_v21 = vmul.f32 1.442695, %v3436_v20 }
 0x430   :  { %4742 = vpow2.f32 %v3439_v21 }
 0x436   :  { %v4741_v24 = vpop.eup %4740 }
 0x437   :  { %3441 = vadd.xlane.f32.xlu1 %v4741_v24 }
 0x43a   :  { %v4743_v25 = vpop.eup %4742 }
 0x43b   :  { %3443 = vadd.xlane.f32.xlu1 %v4743_v25 }
 0x4c4   :  { %v3442_v36 = vpop.xlane.xlu1 %3441 }
 0x4c5   :  { %4744 = vrcp.f32 %v3442_v36 }
 0x4c8   :  { %v3444_v27 = vpop.xlane.xlu1 %3443 }
 0x4c9   :  { %4746 = vrcp.f32 %v3444_v27 }
 0x4cf   :  { %v4745_v28 = vpop.eup %4744 }
 0x4d0   :  { %v3446_v29 = vmul.f32 %v4745_v28, %v4741_v24 }
 0x4d2   :  { %3449 = vst [vmem:[#allocation11] sm:$0xff] %v3446_v29 }
 0x4d3   :  { %v4747_v30 = vpop.eup %4746 }
 0x4d4   :  { %v3448_v32 = vmul.f32 %v4747_v30, %v4743_v25 }
 0x4d6   :  { %3450 = vst [vmem:[#allocation11 + $0x8] sm:$0xff] %v3448_v32 }
 0x4d7   :  { %3455 = vsyncadd [#allocation4], 128  ;;  %s4902_s4 = smov [#allocation11]  }
 0x4d8   :  { %s3456_s8 = sshll.u32 %s4902_s4, 4  ;;  %s3457_s8 = int_to_ptr.vmem [resolvable:$true] %s3456_s8 }
 0x4d9   :  { %s4858_s9 = scalar_lea.vmem %s3457_s8, 128  ;;  %s4862_s10 = scalar_lea.vmem %s3457_s8, 256 }
 0x4da   :  { %p4859_p12 = scmp.ne.s32.totalorder %s3457_s8, %s4858_s9  ;;  %p4863_p13 = scmp.lt.s32.totalorder %s3457_s8, %s3457_s8 }
 0x4db   :  { %p4864_p0 = scmp.lt.s32.totalorder %s4862_s10, %s4858_s9 }
 0x4dd   :  { %p4865_p1 = por %p4864_p0, %p4863_p13 }
 0x4df   :  { %p4866_p2 = pnand %p4865_p1, %p4859_p12 }
 0x4e1   :  { %4869 = shalt.err (!%p4866_p2)
}
 0x4e2   :  { %s4870_s13 = scalar_lea.hbm %s5107_s5, 128 }
 0x4e3   :  { %p4871_p3 = scmp.ne.s32.totalorder %s5107_s5, %s4870_s13  ;;  %p4874_p4 = scmp.lt.u32.totalorder %s4870_s13, %s5107_s5 }
 0x4e5   :  { %p4876_p5 = pnand %p4874_p4, %p4871_p3 }
 0x4e7   :  { %4879 = shalt.err (!%p4876_p5)
}
 0x4e8   :  { %3462 = dma.vmem_to_hbm [thread:$0]  %s3457_s8, 128, %s5107_s5, [#allocation4], %s4892_s1, %s4892_s1, %s4893_s17  }
 0x4e9   :  { %4886 = dma.done.wait [#allocation4], 256  }
 0x4ea   :  { %4887 = vsyncadd [#allocation4], 4294967040 }
 0x4eb   :  { %3466 = vsyncpa [#allocation3], 1 }
 0x4ec   :  { %3467 = vsyncpa [#allocation6], 1 }
 0x4ed   :  { %3468 = vsyncpa [#allocation9], 1 }
 0x4ee   :  { %3469 = vsyncpa [#allocation4], 1 }

</bundles_post_ra>
